<compile_context>
chip_gen: v6e
topology: v6e:2x2x1
jax: 0.10.0
libtpu: 0.0.40
codegen_flags: <defaults>
</compile_context>

<pallas_src>
import math

import jax
import jax.numpy as jnp
from jax.experimental import pallas as pl
from jax.experimental.pallas import tpu as pltpu


def _bcnn_head_kernel(x_ref, attn_ref, wt_ref, b_ref, out_ref, g_ref):
    # x_ref:    (BT, HW, C)    bf16  lane-dense feature block (C on lanes)
    # attn_ref: (1, C)         bf16  attention row, pre-scaled by 1/sqrt(HW)
    # wt_ref:   (C, CPAD)      bf16  fc weight^T, pre-scaled by 1/sqrt(HW), class-padded
    # b_ref:    (1, CPAD)      f32   fc bias (-1e30 in padded lanes)
    # out_ref:  (BT, 1, CPAD)  f32   softmax probabilities (padded)
    # g_ref:    (2, C, C)      bf16  double-buffered sqrt(raw Gram + eps*HW) scratch
    bt, hw, _ = x_ref.shape
    eps_hw = 1e-5 * float(hw)   # sqrt(G/HW + 1e-5) == sqrt(G + 1e-5*HW) / sqrt(HW)

    def one_sample(b):
        slot = b & 1

        # Bilinear (Gram) pooling on the MXU: raw G = X^T X, bf16 operands, f32 acc.
        xs = x_ref[b]                                              # (HW, C) bf16
        gram = jax.lax.dot_general(
            xs, xs, dimension_numbers=(((0,), (0,)), ((), ())),
            preferred_element_type=jnp.float32)                    # (C, C) f32

        # f32 sqrt for accuracy, bf16 result parked in the double-buffered scratch.
        sqrtg = jnp.sqrt(gram + eps_hw).astype(jnp.bfloat16)       # (C, C) bf16
        g_ref[slot] = sqrtg

        # Attention score: G is symmetric, so this is a row-vector MXU matvec.
        # Uses the live sqrtg value (no scratch reload); 1/sqrt(HW) already folded
        # into attn_ref, so this equals attn^T sqrt(G/HW + 1e-5) exactly.
        score = jnp.dot(attn_ref[...], sqrtg,
                        preferred_element_type=jnp.float32)        # (1, C)
        score = score - jnp.max(score, axis=-1, keepdims=True)
        e = jnp.exp(score)
        attn_p = e * pl.reciprocal(jnp.sum(e, axis=-1, keepdims=True), approx=True)

        # Condensed vector (softmax-dependent): re-read sqrt(G) from VMEM scratch.
        condensed = jnp.dot(attn_p.astype(jnp.bfloat16), g_ref[slot],
                            preferred_element_type=jnp.float32)    # (1, C)

        # TODO(synk): Dropout(0.5) is treated as inference-mode identity (no RNG mask).

        # Fully connected (1/sqrt(HW) folded into wt) + softmax over classes.
        logits = jnp.dot(condensed.astype(jnp.bfloat16), wt_ref[...],
                         preferred_element_type=jnp.float32) + b_ref[...]   # (1, CPAD)
        logits = logits - jnp.max(logits, axis=-1, keepdims=True)
        el = jnp.exp(logits)
        out_ref[b] = el * pl.reciprocal(jnp.sum(el, axis=-1, keepdims=True), approx=True)

    if bt == 1:
        one_sample(0)
    else:
        # Several samples per grid step amortize the ~0.35 us per-step pipeline
        # overhead on the single-TC v5e/v6e; unrolled for LLO scheduler visibility.
        def body(b, carry):
            one_sample(b)
            return carry
        jax.lax.fori_loop(0, bt, body, 0, unroll=True)


def _pick_samples_per_step(n):
    """Largest divisor of n that is <= 8 while keeping grid length >= 2 (v7x: both TCs)."""
    bt = 1
    for cand in range(min(8, n), 0, -1):
        if n % cand == 0 and (n // cand >= 2 or n == 1):
            bt = cand
            break
    return bt


def bcnn_head(feat_nchw, attn_w, fc_w, fc_b, *, samples_per_step=None):
    """feat_nchw: (N, C, H, W); attn_w: (C, 1); fc_w: (classes, C); fc_b: (classes,)."""
    N, C, H, W = feat_nchw.shape
    HW = H * W
    classes = fc_w.shape[0]
    cpad = ((classes + 127) // 128) * 128          # lane-dense class dimension

    bt = _pick_samples_per_step(N) if samples_per_step is None else samples_per_step
    assert N % bt == 0, "samples_per_step must divide the batch"

    # Lane-dense (N, HW, C) bf16 features: C on lanes, halves the per-step DMA.
    # TODO(synk): at large N, fuse this layout change into the backbone producer
    #             instead of paying a separate HBM read+write pass here.
    x = jnp.transpose(feat_nchw.reshape(N, C, HW), (0, 2, 1)).astype(jnp.bfloat16)

    # Fold the 1/sqrt(HW) Gram normalization into the (tiny, one-time) weights so the
    # kernel never rescales features or the Gram. Exact for the score/logits algebra.
    inv_sqrt_hw = 1.0 / math.sqrt(float(HW))
    attn_row = (jnp.asarray(attn_w, jnp.float32).reshape(1, C)
                * inv_sqrt_hw).astype(jnp.bfloat16)
    wt = (jnp.zeros((C, cpad), jnp.float32)
          .at[:, :classes].set(jnp.asarray(fc_w, jnp.float32).T * inv_sqrt_hw)
          ).astype(jnp.bfloat16)
    # Padded classes get a -1e30 bias so their exp() is exactly 0 in the softmax.
    bias = jnp.full((1, cpad), -1e30, jnp.float32).at[0, :classes].set(
        jnp.asarray(fc_b, jnp.float32))

    out = pl.pallas_call(
        _bcnn_head_kernel,
        out_shape=jax.ShapeDtypeStruct((N, 1, cpad), jnp.float32),
        grid_spec=pltpu.PrefetchScalarGridSpec(
            num_scalar_prefetch=0,
            grid=(N // bt,),
            in_specs=[
                pl.BlockSpec((bt, HW, C), lambda n: (n, 0, 0)),   # feature block
                pl.BlockSpec((1, C), lambda n: (0, 0)),           # attention row
                pl.BlockSpec((C, cpad), lambda n: (0, 0)),        # fc weight^T (padded)
                pl.BlockSpec((1, cpad), lambda n: (0, 0)),        # fc bias (padded)
            ],
            out_specs=pl.BlockSpec((bt, 1, cpad), lambda n: (n, 0, 0)),
            scratch_shapes=[pltpu.VMEM((2, C, C), jnp.bfloat16)],  # double-buffered sqrt(G)
        ),
        compiler_params=pltpu.CompilerParams(
            dimension_semantics=("parallel",)),   # batch axis splits across TCs on v7x
    )(x, attn_row, wt, bias)
    return out.reshape(N, cpad)[:, :classes]


def _bcnn_head_ref(feat_nchw, attn_w, fc_w, fc_b):
    """Pure-JAX f32 reference mirroring the PyTorch forward."""
    N, C, H, W = feat_nchw.shape
    hw = H * W
    x = feat_nchw.reshape(N, C, hw).astype(jnp.float32)
    g = jnp.sqrt(jnp.einsum("nch,ndh->ncd", x, x) / hw + 1e-5)
    score = jnp.einsum("ncd,do->nc", g, jnp.asarray(attn_w, jnp.float32))
    p = jax.nn.softmax(score, axis=1)[:, :, None]
    condensed = jnp.sum(g * p, axis=1)
    logits = condensed @ jnp.asarray(fc_w, jnp.float32).T + jnp.asarray(fc_b, jnp.float32)
    return jax.nn.softmax(logits, axis=1)


if __name__ == "__main__":
    # Small shapes consistent with the module's head:
    #   features -> 256, fmap_size -> 4, classnumber -> 10, batch -> 2
    N, C, H, W = 2, 256, 4, 4
    classes = 10

    key = jax.random.PRNGKey(0)
    k_feat, k_attn, k_fc = jax.random.split(key, 3)

    # Synthetic (post-ReLU, hence non-negative) backbone feature map.
    feat = jax.nn.relu(jax.random.normal(k_feat, (N, C, H, W), jnp.float32))

    # Deterministic xavier_normal-style parameter init.
    attn_std = math.sqrt(2.0 / (C + 1))
    attn_w = attn_std * jax.random.normal(k_attn, (C, 1), jnp.float32)
    fc_std = math.sqrt(2.0 / (classes + C))
    fc_w = fc_std * jax.random.normal(k_fc, (classes, C), jnp.float32)
    fc_b = jnp.zeros((classes,), jnp.float32)       # init.constant_(bias, 0)

    out = bcnn_head(feat, attn_w, fc_w, fc_b)
    jax.block_until_ready(out)

    assert out.shape == (N, classes)
    ref = _bcnn_head_ref(feat, attn_w, fc_w, fc_b)
    assert bool(jnp.all(jnp.isfinite(out)))
    # Rows sum to ~1 (approx. EUP reciprocal in the softmax denominator).
    assert bool(jnp.allclose(jnp.sum(out, axis=1), 1.0, atol=5e-3))
    # Loose tolerance: MXU operands and the Gram scratch are bf16 (f32 accumulation).
    assert bool(jnp.allclose(out, ref, atol=5e-2))
    print("KERNEL_OK")
</pallas_src>

<mosaic_0001>
module attributes {stable_mosaic.version = 11 : i64} {
  func.func @_bcnn_head_kernel(%arg0: i32, %arg1: memref<1x16x256xbf16, #tpu.memory_space<vmem>>, %arg2: memref<1x256xbf16, #tpu.memory_space<vmem>>, %arg3: memref<256x128xbf16, #tpu.memory_space<vmem>>, %arg4: memref<1x128xf32, #tpu.memory_space<vmem>>, %arg5: memref<1x1x128xf32, #tpu.memory_space<vmem>>, %arg6: memref<2x256x256xbf16, #tpu.memory_space<vmem>>) attributes {dimension_semantics = [#tpu.dimension_semantics<parallel>], iteration_bounds = array<i64: 2>, scalar_prefetch = 0 : i64, scratch_operands = 1 : i64, tpu.core_type = #tpu.core_type<tc>, window_params = [{transform_indices = @transform_0, window_bounds = array<i64: 1, 16, 256>}, {pipeline_mode = #tpu.pipeline_mode<synchronous>, transform_indices = @transform_1, window_bounds = array<i64: 1, 256>}, {pipeline_mode = #tpu.pipeline_mode<synchronous>, transform_indices = @transform_2, window_bounds = array<i64: 256, 128>}, {pipeline_mode = #tpu.pipeline_mode<synchronous>, transform_indices = @transform_3, window_bounds = array<i64: 1, 128>}, {transform_indices = @transform_4, window_bounds = array<i64: 1, 1, 128>}]} {
    %c0 = arith.constant 0 : index
    %c0_0 = arith.constant 0 : index
    %c0_1 = arith.constant 0 : index
    %0 = vector.load %arg1[%c0, %c0_0, %c0_1] : memref<1x16x256xbf16, #tpu.memory_space<vmem>>, vector<1x16x256xbf16>
    %1 = vector.shape_cast %0 : vector<1x16x256xbf16> to vector<16x256xbf16>
    %cst = arith.constant dense<0.000000e+00> : vector<256x256xf32>
    %2 = tpu.matmul %1, %1, %cst {dimension_numbers = #tpu.dot_dimension_numbers<[0], [0], [1], [1], [0, 1, 1, 1], [], []>} : vector<16x256xbf16>, vector<16x256xbf16>, vector<256x256xf32> -> vector<256x256xf32>
    %cst_2 = arith.constant 1.600000e-04 : f32
    %3 = vector.broadcast %cst_2 : f32 to vector<256x256xf32>
    %4 = arith.addf %2, %3 : vector<256x256xf32>
    %5 = math.sqrt %4 : vector<256x256xf32>
    %6 = arith.truncf %5 : vector<256x256xf32> to vector<256x256xbf16>
    %c0_3 = arith.constant 0 : index
    %c0_4 = arith.constant 0 : index
    %c0_5 = arith.constant 0 : index
    %7 = vector.load %arg6[%c0_3, %c0_4, %c0_5] : memref<2x256x256xbf16, #tpu.memory_space<vmem>>, vector<1x256x256xbf16>
    %8 = vector.shape_cast %7 : vector<1x256x256xbf16> to vector<256x256xbf16>
    %9 = vector.shape_cast %6 : vector<256x256xbf16> to vector<1x256x256xbf16>
    tpu.vector_store %arg6[%c0_3, %c0_4, %c0_5], %9 {strides = array<i32>} : memref<2x256x256xbf16, #tpu.memory_space<vmem>>, vector<1x256x256xbf16>,
    %c0_6 = arith.constant 0 : index
    %c0_7 = arith.constant 0 : index
    %10 = vector.load %arg2[%c0_6, %c0_7] : memref<1x256xbf16, #tpu.memory_space<vmem>>, vector<1x256xbf16>
    %cst_8 = arith.constant dense<0.000000e+00> : vector<1x256xf32>
    %11 = tpu.matmul %10, %6, %cst_8 {dimension_numbers = #tpu.dot_dimension_numbers<[1], [0], [0], [1], [0, 0, 1, 1], [], []>} : vector<1x256xbf16>, vector<256x256xbf16>, vector<1x256xf32> -> vector<1x256xf32>
    %cst_9 = arith.constant dense<0xFF800000> : vector<1xf32>
    %12 = vector.multi_reduction <maximumf>, %11, %cst_9 [1] : vector<1x256xf32> to vector<1xf32>
    %13 = vector.shape_cast %12 : vector<1xf32> to vector<1x1xf32>
    %14 = vector.broadcast %13 : vector<1x1xf32> to vector<1x256xf32>
    %15 = arith.subf %11, %14 : vector<1x256xf32>
    %16 = math.exp %15 : vector<1x256xf32>
    %cst_10 = arith.constant dense<0.000000e+00> : vector<1xf32>
    %17 = vector.multi_reduction <add>, %16, %cst_10 [1] : vector<1x256xf32> to vector<1xf32>
    %18 = vector.shape_cast %17 : vector<1xf32> to vector<1x1xf32>
    %19 = tpu.reciprocal %18 {approx = true} : vector<1x1xf32> -> vector<1x1xf32>
    %20 = vector.broadcast %19 : vector<1x1xf32> to vector<1x256xf32>
    %21 = arith.mulf %16, %20 : vector<1x256xf32>
    %22 = arith.truncf %21 : vector<1x256xf32> to vector<1x256xbf16>
    %c0_11 = arith.constant 0 : index
    %c0_12 = arith.constant 0 : index
    %c0_13 = arith.constant 0 : index
    %23 = vector.load %arg6[%c0_11, %c0_12, %c0_13] : memref<2x256x256xbf16, #tpu.memory_space<vmem>>, vector<1x256x256xbf16>
    %24 = vector.shape_cast %23 : vector<1x256x256xbf16> to vector<256x256xbf16>
    %cst_14 = arith.constant dense<0.000000e+00> : vector<1x256xf32>
    %25 = tpu.matmul %22, %24, %cst_14 {dimension_numbers = #tpu.dot_dimension_numbers<[1], [0], [0], [1], [0, 0, 1, 1], [], []>} : vector<1x256xbf16>, vector<256x256xbf16>, vector<1x256xf32> -> vector<1x256xf32>
    %26 = arith.truncf %25 : vector<1x256xf32> to vector<1x256xbf16>
    %c0_15 = arith.constant 0 : index
    %c0_16 = arith.constant 0 : index
    %27 = vector.load %arg3[%c0_15, %c0_16] : memref<256x128xbf16, #tpu.memory_space<vmem>>, vector<256x128xbf16>
    %cst_17 = arith.constant dense<0.000000e+00> : vector<1x128xf32>
    %28 = tpu.matmul %26, %27, %cst_17 {dimension_numbers = #tpu.dot_dimension_numbers<[1], [0], [0], [1], [0, 0, 1, 1], [], []>} : vector<1x256xbf16>, vector<256x128xbf16>, vector<1x128xf32> -> vector<1x128xf32>
    %c0_18 = arith.constant 0 : index
    %c0_19 = arith.constant 0 : index
    %29 = vector.load %arg4[%c0_18, %c0_19] : memref<1x128xf32, #tpu.memory_space<vmem>>, vector<1x128xf32>
    %30 = arith.addf %28, %29 : vector<1x128xf32>
    %cst_20 = arith.constant dense<0xFF800000> : vector<1xf32>
    %31 = vector.multi_reduction <maximumf>, %30, %cst_20 [1] : vector<1x128xf32> to vector<1xf32>
    %32 = vector.shape_cast %31 : vector<1xf32> to vector<1x1xf32>
    %33 = vector.broadcast %32 : vector<1x1xf32> to vector<1x128xf32>
    %34 = arith.subf %30, %33 : vector<1x128xf32>
    %35 = math.exp %34 : vector<1x128xf32>
    %cst_21 = arith.constant dense<0.000000e+00> : vector<1xf32>
    %36 = vector.multi_reduction <add>, %35, %cst_21 [1] : vector<1x128xf32> to vector<1xf32>
    %37 = vector.shape_cast %36 : vector<1xf32> to vector<1x1xf32>
    %38 = tpu.reciprocal %37 {approx = true} : vector<1x1xf32> -> vector<1x1xf32>
    %39 = vector.broadcast %38 : vector<1x1xf32> to vector<1x128xf32>
    %40 = arith.mulf %35, %39 : vector<1x128xf32>
    %c0_22 = arith.constant 0 : index
    %c0_23 = arith.constant 0 : index
    %c0_24 = arith.constant 0 : index
    %41 = vector.load %arg5[%c0_22, %c0_23, %c0_24] : memref<1x1x128xf32, #tpu.memory_space<vmem>>, vector<1x1x128xf32>
    %42 = vector.shape_cast %41 : vector<1x1x128xf32> to vector<1x128xf32>
    %43 = vector.shape_cast %40 : vector<1x128xf32> to vector<1x1x128xf32>
    tpu.vector_store %arg5[%c0_22, %c0_23, %c0_24], %43 {strides = array<i32>} : memref<1x1x128xf32, #tpu.memory_space<vmem>>, vector<1x1x128xf32>,
    return
  }
  func.func @transform_0(%arg0: i32) -> (i32, i32, i32) {
    %c0_i32 = arith.constant 0 : i32
    %c0_i32_0 = arith.constant 0 : i32
    %c0_i32_1 = arith.constant 0 : i32
    return %arg0, %c0_i32, %c0_i32_0 : i32, i32, i32
  }
  func.func @transform_1(%arg0: i32) -> (i32, i32) {
    %c0_i32 = arith.constant 0 : i32
    %c0_i32_0 = arith.constant 0 : i32
    %c0_i32_1 = arith.constant 0 : i32
    return %c0_i32, %c0_i32_0 : i32, i32
  }
  func.func @transform_2(%arg0: i32) -> (i32, i32) {
    %c0_i32 = arith.constant 0 : i32
    %c0_i32_0 = arith.constant 0 : i32
    %c0_i32_1 = arith.constant 0 : i32
    return %c0_i32, %c0_i32_0 : i32, i32
  }
  func.func @transform_3(%arg0: i32) -> (i32, i32) {
    %c0_i32 = arith.constant 0 : i32
    %c0_i32_0 = arith.constant 0 : i32
    %c0_i32_1 = arith.constant 0 : i32
    return %c0_i32, %c0_i32_0 : i32, i32
  }
  func.func @transform_4(%arg0: i32) -> (i32, i32, i32) {
    %c0_i32 = arith.constant 0 : i32
    %c0_i32_0 = arith.constant 0 : i32
    %c0_i32_1 = arith.constant 0 : i32
    return %arg0, %c0_i32, %c0_i32_0 : i32, i32, i32
  }
}

</mosaic_0001>

<bundles_post_ra>
// kernel: tpu_custom_call.1
= control target key start
LH: loop header
LB: loop body
LE: loop exit
PB: predicated region body
PF: predicated region fallthrough
CT: control target
= control target key end

     0   :  { %s3726_s0 = inlined_call_operand.hbm [shape: bf16[2,16,256], index: 0, kind: input, shape index: {}]   ;;  %s3727_s1 = inlined_call_operand.hbm [shape: bf16[1,256], index: 1, kind: input, shape index: {}]   ;;  %s3728_s2 = inlined_call_operand.hbm [shape: bf16[256,128], index: 2, kind: input, shape index: {}]   ;;  %s3729_s3 = inlined_call_operand.vmem [shape: f32[1,128], index: 3, kind: input, shape index: {}]   ;;  %s3730_s4 = inlined_call_operand.hbm [shape: f32[2,1,128], index: 4, kind: output, shape index: {}]  }
   0x1   :  { %3751 = sst [smem:[#allocation29_spill]] %s3727_s1 }
   0x2   :  { %9 = vsyncpa [#allocation4], 0 }
   0x3   :  { %11 = vsyncpa [#allocation4 + $0x1], 0 }
   0x4   :  { %12 = vsyncpa [#allocation7], 0 }
   0x5   :  { %13 = vsyncpa [#allocation5], 0 }
   0x6   :  { %15 = vsyncpa [#allocation5 + $0x1], 0  ;;  %s2420_s15 = smov 0   ;;  %s2422_s16 = smov 0  }
   0x7   :  { %s2424_s17 = smov 0   ;;  %s2426_s18 = smov 0  }
   0x8 LB: > { %s2441_s19 = sadd.s32 4294967295, %s2383_s18   ;;  %s1804_s20 = sadd.s32 4294967294, %s2383_s18   ;;  %s2383_s18 = sphi %s2426_s18, %s3864_s18   ;;  %s2379_s17 = sphi %s2424_s17, %s3863_s17   ;;  %s2375_s16 = sphi %s2422_s16, %s3862_s16   ;;  %s2371_s15 = sphi %s2420_s15, %s3861_s15  }
   0x9   : > { %s2445_s21 = sadd.s32 1, %s2383_s18   ;;  %s28_s22 = sadd.s32 1, %s2379_s17 }
   0xa   : > { %s25_s23 = ssub.s32 %s2383_s18, %s2445_s21  ;;  %p35_p0 = scmp.ne.s32.totalorder %s2379_s17, %s2375_s16 }
   0xb   : > { %p26_p1 = scmp.eq.s32.totalorder %s25_s23, 0  ;;  %p36_p2 = scmp.eq.s32.totalorder %s2383_s18, 0 }
   0xc   : > { %p41_p3 = scmp.ne.s32.totalorder %s2375_s16, %s2371_s15  ;;  %p3731_p4 = scmp.eq.s32.totalorder %s2441_s19, 0 }
   0xd   : > { %s2457_s24 = scalar_select %p26_p1, %s2379_s17, %s28_s22  }
   0xe   : > { %p2459_p5 = por %p36_p2, %p35_p0  ;;  %p2465_p6 = por %p3731_p4, %p41_p3 }
   0xf   : > { %p128_p7 = scmp.eq.s32.totalorder %s2441_s19, 1  ;;  %p134_p8 = scmp.eq.s32.totalorder %s1804_s20, 1 }
  0x10   : > { %s3753_s26 = scalar_select %p2465_p6, 1, 0 }
  0x11   : > { %p1805_p9 = scmp.ge.s32.totalorder %s2383_s18, 1  ;;  %p141_p10 = scmp.lt.s32.totalorder %s2383_s18, 3 }
  0x12   : > { %p2472_p11 = por %p128_p7, %p35_p0  ;;  %p2476_p12 = por %p134_p8, %p41_p3 }
  0x13   : > { %p2480_p13 = pnand %p1805_p9, %p141_p10  ;;  %s2385_s30 = smov [#allocation6]  }
  0x14   : > { %s3754_s27 = scalar_select %p2472_p11, 1, 0 }
  0x15   : > { %s3755_s28 = scalar_select %p2476_p12, 1, 0 }
  0x16   : > { %s3756_s29 = scalar_select %p2480_p13, 1, 0 }
  0x17   : > { %p2017_p2 = pneg %p2480_p13  ;;  %s154_s5 = sshll.u32 %s2385_s30, 4  ;;  %s155_s5 = int_to_ptr.vmem [resolvable:$true] %s154_s5 }
  0x18   : > { %p2034_p4 = scmp.lt.s32.totalorder %s2383_s18, 2  ;;  %p3757_p0 = scmp.eq.s32.totalorder %s2441_s19, 0 }
  0x19   : > { %s2386_s8 = smov [#allocation8]   ;;  %s2246_s10 = scalar_lea.vmem %s155_s5, 32 }
  0x1a   : > { %p2490_p7 = pnand %p2017_p2, %p3757_p0  ;;  %p2496_p3 = pnand %p2034_p4, %p2459_p5 }
  0x1b   : > { %s164_s9 = sshll.u32 %s2386_s8, 4  ;;  %p2247_p9 = scmp.ne.s32.totalorder %s155_s5, %s2246_s10  ;;  %s165_s9 = int_to_ptr.vmem [resolvable:$true] %s164_s9 }
  0x1c   : > { %p2237_p8 = pneg %p2490_p7  ;;  %p2254_p0 = scmp.lt.s32.totalorder %s155_s5, %s155_s5 }
  0x1d   : > { %p2255_p1 = scmp.lt.s32.totalorder %s2246_s10, %s2246_s10 }
  0x1e   : > { %p2249_p10 = pnand %p2247_p9, %p2237_p8 }
  0x1f   : > { %p2256_p12 = por %p2255_p1, %p2254_p0 }
  0x20   : > { %p2250_p2 = pneg %p2249_p10 }
  0x22   : > { %p2257_p11 = pnand %p2256_p12, %p2250_p2 }
  0x24   : > { %2260 = shalt.err (!%p2257_p11)
}
  0x25   : > { %s3760_s1 = sld [smem:[#allocation29_spill]]  ;;  %s181_s13 = sand.u32 1, %s2379_s17  }
  0x26   : > { %s2272_s14 = scalar_lea.vmem %s165_s9, 2048  ;;  %p2280_p10 = scmp.lt.s32.totalorder %s165_s9, %s165_s9 }
  0x27   : > { %p2273_p4 = scmp.ne.s32.totalorder %s165_s9, %s2272_s14  ;;  %p2281_p6 = scmp.lt.s32.totalorder %s2272_s14, %s2272_s14 }
  0x29   : > { %p2275_p5 = pnand %p2273_p4, %p2237_p8  ;;  %p2282_p1 = por %p2281_p6, %p2280_p10 }
  0x2b   : > { %2020 = dma.hbm_to_vmem [thread:$0]  (!%p2490_p7), %s3760_s1, 32, %s155_s5, [#allocation7]  }
  0x2c   : > { %p2276_p9 = pneg %p2275_p5 }
  0x2e   : > { %p2283_p12 = pnand %p2282_p1, %p2276_p9 }
  0x30   : > { %2286 = shalt.err (!%p2283_p12)
}
  0x31   : > { %s2387_s20 = smov 64   ;;  %s2388_s22 = smov 4  }
  0x32   : > { %2023 = dma.hbm_to_vmem [thread:$0]  (!%p2490_p7), %s3728_s2, 2048, %s165_s9, [#allocation7], %s2387_s20, %s2387_s20, %s2388_s22  }
  0x33   : > { %s1809_s30 = sshll.u32 %s181_s13, 4  ;;  %s1918_s5 = sshll.u32 %s2383_s18, 8 }
  0x34   : > { %s2523_s11 = scalar_lea.hbm %s3726_s0, %s1918_s5  ;;  %s185_s12 = scalar_lea.vmem [#allocation3], %s1809_s30 }
  0x35   : > { %s192_s14 = sshll.u32 %s185_s12, 4  ;;  %s2527_s1 = scalar_lea.sflag [#allocation4], %s181_s13  ;;  %s2525_s14 = int_to_ptr.vmem [resolvable:$true] %s192_s14 }
  0x36   : > { %s2287_s6 = scalar_lea.hbm %s2523_s11, 256  ;;  %p2289_p11 = pneg %p2496_p3 }
  0x37   : > { %p2288_p6 = scmp.ne.s32.totalorder %s2523_s11, %s2287_s6  ;;  %s2292_s22 = scalar_lea.hbm %s3726_s0, 512 }
  0x38   : > { %p2293_p2 = scmp.lt.s32.totalorder %s2523_s11, %s3726_s0  ;;  %p2294_p0 = scmp.lt.s32.totalorder %s2292_s22, %s2287_s6 }
  0x39   : > { %p2290_p7 = pnand %p2289_p11, %p2288_p6 }
  0x3a   : > { %p2295_p4 = por %p2294_p0, %p2293_p2 }
  0x3b   : > { %p2291_p8 = pneg %p2290_p7 }
  0x3d   : > { %p2296_p5 = pnand %p2295_p4, %p2291_p8 }
  0x3f   : > { %2299 = shalt.err (!%p2296_p5)
}
  0x40   : > { %s2300_s13 = scalar_lea.vmem %s2525_s14, 256  ;;  %s2389_s30 = smov [#allocation3]  }
  0x41   : > { %p2301_p9 = scmp.ne.s32.totalorder %s2525_s14, %s2300_s13  ;;  %s2305_s5 = sshll.u32 %s2389_s30, 4  ;;  %s2306_s5 = int_to_ptr.vmem [resolvable:$false] %s2305_s5 }
  0x42   : > { %s2307_s8 = scalar_lea.vmem %s2306_s5, 512  ;;  %p2308_p12 = scmp.lt.s32.totalorder %s2525_s14, %s2306_s5 }
  0x43   : > { %p2303_p10 = pnand %p2301_p9, %p2289_p11  ;;  %p2309_p6 = scmp.lt.s32.totalorder %s2307_s8, %s2300_s13 }
  0x45   : > { %p2304_p1 = pneg %p2303_p10  ;;  %p2310_p7 = por %p2309_p6, %p2308_p12 }
  0x47   : > { %p2311_p13 = pnand %p2310_p7, %p2304_p1 }
  0x49   : > { %2314 = shalt.err (!%p2311_p13)
}
  0x4a   : > { %s2390_s10 = smov 128   ;;  %s2391_s12 = smov 8  }
  0x4b   : > { %2027 = dma.hbm_to_vmem [thread:$0]  (!%p2496_p3), %s2523_s11, 256, %s2525_s14, %s2527_s1, %s2390_s10, %s2390_s10, %s2391_s12  }
  0x4c   : > { %p3761_p11 = scmp.ne.s32.totalorder %s3756_s29, 0 }
  0x4e   : > { %204 = sbr.rel (%p3761_p11) target bundleno = 1816 (0x718), region = 36 }
  0x53   : > { %s2551_s6 = sand.u32 1, %s2375_s16   ;;  %p3762_p13 = scmp.ne.s32.totalorder %s3753_s26, 0 }
  0x54   : > { %s1813_s9 = sshll.u32 %s2551_s6, 4  ;;  %s207_s20 = scalar_lea.sflag [#allocation4], %s2551_s6 }
  0x55   : > { %s210_s22 = scalar_lea.vmem [#allocation3], %s1813_s9 }
  0x56   : > { %2358 = dma.done.wait (%p3762_p13), %s207_s20, 256  }
  0x57   : > { %2360 = vsyncadd (%p3762_p13), %s207_s20, 4294967040  ;;  %p3763_p8 = scmp.eq.s32.totalorder %s2441_s19, 0 }
  0x59   : > { %2362 = dma.done.wait (%p3763_p8), [#allocation7], 2080   ;;  %p3764_p3 = pmov %p3763_p8 }
  0x5a   : > { %v2392_v0 = vmov 0   ;;  %v2078_v1 = vld [vmem:[%s210_s22] ss:$8 sps:$4 sm:$0xff]   ;;  %v2080_v2 = vld [vmem:[%s210_s22 + $0x4] ss:$8 sps:$4 sm:$0xff]   ;;  %vm287_vm0 = vcmask 130048  }
  0x5b   : > { %2364 = vsyncadd (%p3764_p3), [#allocation7], 4294965216  ;;  %368 = vmatprep.mubr.bf16.mxu0 %v2392_v0  ;;  %255 = vxpose.xlu0.c.b16.start.end [1/1] (short) %v2078_v1, 128  ;;  %s1915_s29 = sshll.u32 %s2441_s19, 4  ;;  %s241_s7 = scalar_lea.vmem [#allocation9], %s2551_s6 }
  0x5c   : > { %350 = vmatprep.subr.bf16.mxu0 %v2080_v2  ;;  %s1719_s11 = sshll.u32 %s241_s7, 4  ;;  %s1717_s25 = scalar_lea.hbm %s3730_s4, %s1915_s29  ;;  %s1720_s11 = int_to_ptr.vmem [resolvable:$true] %s1719_s11 }
  0x5d   : > { %351 = vmatpush1.bf16.msra.mxu0 %v2078_v1  ;;  %s1707_s13 = scalar_lea.sflag [#allocation5], %s2551_s6  ;;  %s2315_s30 = scalar_lea.vmem %s1720_s11, 16 }
  0x5e   : > { %p2316_p2 = scmp.ne.s32.totalorder %s1720_s11, %s2315_s30  ;;  %p3858_p0 = scmp.ne.s32.totalorder %s3754_s27, 0 }
  0x5f   : > { %s2394_s5 = smov [#allocation9]  }
  0x60   : > { %p2317_p4 = pnand %p2316_p2, %p3858_p0  ;;  %s2319_s8 = sshll.u32 %s2394_s5, 4  ;;  %s2320_s8 = int_to_ptr.vmem [resolvable:$false] %s2319_s8 }
  0x61   : > { %s2321_s19 = scalar_lea.vmem %s2320_s8, 32  ;;  %p2322_p9 = scmp.lt.s32.totalorder %s1720_s11, %s2320_s8 }
  0x62   : > { %p2318_p5 = pneg %p2317_p4  ;;  %p2323_p10 = scmp.lt.s32.totalorder %s2321_s19, %s2315_s30 }
  0x64   : > { %p2324_p1 = por %p2323_p10, %p2322_p9 }
  0x66   : > { %p2325_p12 = pnand %p2324_p1, %p2318_p5 }
  0x78   : > { %271 = vxpose.xlu0.c.b16.start.end [1/1] (short) %v2080_v2, 128 }
  0xbd   : > { %v263_v3 = vpop.trf.xlu0 }
  0xbe   : > { %1818 = vmatmul.mubr.msk.bf16.vlgmr.msra.gmra.mxu0 %vm287_vm0, %v263_v3 }
  0xbf   : > { %378 = vmatprep.mubr.bf16.mxu0 %v2392_v0 }
  0xc1   : > { %v264_v4 = vpop.trf.xlu0 }
  0xc5   : > { %v265_v5 = vpop.trf.xlu0 }
  0xc6   : > { %1819 = vmatmul.mubr.msk.bf16.gmra.mxu0 %vm287_vm0, %v264_v4 }
  0xc7   : > { %388 = vmatprep.mubr.bf16.mxu0 %v2392_v0 }
  0xc9   : > { %v266_v6 = vpop.trf.xlu0 }
  0xcd   : > { %v267_v7 = vpop.trf.xlu0 }
  0xce   : > { %1820 = vmatmul.mubr.msk.bf16.gmra.mxu0 %vm287_vm0, %v265_v5 }
  0xcf   : > { %398 = vmatprep.mubr.bf16.mxu0 %v2392_v0 }
  0xd1   : > { %v268_v8 = vpop.trf.xlu0 }
  0xd5   : > { %v269_v9 = vpop.trf.xlu0 }
  0xd6   : > { %1821 = vmatmul.mubr.msk.bf16.gmra.mxu0 %vm287_vm0, %v266_v6 }
  0xd7   : > { %408 = vmatprep.mubr.bf16.mxu0 %v2392_v0 }
  0xd9   : > { %v270_v10 = vpop.trf.xlu0 }
  0xdd   : > { %v279_v11 = vpop.trf.xlu0 }
  0xde   : > { %1822 = vmatmul.mubr.msk.bf16.gmra.mxu0 %vm287_vm0, %v267_v7 }
  0xdf   : > { %418 = vmatprep.mubr.bf16.mxu0 %v2392_v0 }
  0xe1   : > { %v280_v12 = vpop.trf.xlu0 }
  0xe5   : > { %v281_v13 = vpop.trf.xlu0 }
  0xe6   : > { %1823 = vmatmul.mubr.msk.bf16.gmra.mxu0 %vm287_vm0, %v268_v8 }
  0xe7   : > { %428 = vmatprep.mubr.bf16.mxu0 %v2392_v0 }
  0xe9   : > { %v282_v14 = vpop.trf.xlu0 }
  0xed   : > { %v283_v15 = vpop.trf.xlu0 }
  0xee   : > { %1824 = vmatmul.mubr.msk.bf16.gmra.mxu0 %vm287_vm0, %v269_v9 }
  0xef   : > { %438 = vmatprep.mubr.bf16.mxu0 %v2392_v0 }
  0xf1   : > { %v284_v16 = vpop.trf.xlu0 }
  0xf5   : > { %v285_v17 = vpop.trf.xlu0 }
  0xf6   : > { %1825 = vmatmul.mubr.msk.bf16.gmra.mxu0 %vm287_vm0, %v270_v10 }
  0xf7   : > { %448 = vmatprep.mubr.bf16.mxu0 %v2392_v0 }
  0xf9   : > { %v286_v18 = vpop.trf.xlu0 }
  0xfe   : > { %1826 = vmatmul.mubr.msk.bf16.gmra.mxu0 %vm287_vm0, %v279_v11 }
  0xff   : > { %458 = vmatprep.mubr.bf16.mxu0 %v2392_v0 }
 0x106   : > { %1827 = vmatmul.mubr.msk.bf16.gmra.mxu0 %vm287_vm0, %v280_v12 }
 0x107   : > { %468 = vmatprep.mubr.bf16.mxu0 %v2392_v0 }
 0x10e   : > { %1828 = vmatmul.mubr.msk.bf16.gmra.mxu0 %vm287_vm0, %v281_v13 }
 0x10f   : > { %478 = vmatprep.mubr.bf16.mxu0 %v2392_v0 }
 0x116   : > { %1829 = vmatmul.mubr.msk.bf16.gmra.mxu0 %vm287_vm0, %v282_v14 }
 0x117   : > { %488 = vmatprep.mubr.bf16.mxu0 %v2392_v0 }
 0x11e   : > { %1830 = vmatmul.mubr.msk.bf16.gmra.mxu0 %vm287_vm0, %v283_v15 }
 0x11f   : > { %498 = vmatprep.mubr.bf16.mxu0 %v2392_v0 }
 0x126   : > { %1831 = vmatmul.mubr.msk.bf16.gmra.mxu0 %vm287_vm0, %v284_v16 }
 0x127   : > { %508 = vmatprep.mubr.bf16.mxu0 %v2392_v0 }
 0x12e   : > { %1832 = vmatmul.mubr.msk.bf16.gmra.mxu0 %vm287_vm0, %v285_v17 }
 0x12f   : > { %518 = vmatprep.mubr.bf16.mxu0 %v2392_v0 }
 0x136   : > { %1833 = vmatmul.mubr.msk.bf16.gmra.mxu0 %vm287_vm0, %v286_v18 }
 0x17e   : > { %v370_v19 = vpop.f32.mrf.mxu0 }
 0x17f   : > { %v2579_v35 = vadd.f32 0.00016, %v370_v19 }
 0x180   : > { %v372_v20 = vpop.f32.mrf.mxu0 }
 0x181   : > { %v2581_v36 = vadd.f32 0.00016, %v372_v20  ;;  %2097 = vrsqrt.f32 %v2579_v35  ;;  %vm531_vm1 = vcmp.eq.f32.partialorder %v2579_v35, inf  ;;  %vm533_vm2 = vcmp.eq.f32.partialorder %v2579_v35, 0.0 }
 0x182   : > { %v374_v21 = vpop.f32.mrf.mxu0  ;;  %v534_v63 = vand.u32 2147483648, %v2579_v35 }
 0x183   : > { %2099 = vrsqrt.f32 %v2581_v36  ;;  %v2589_v39 = vadd.f32 0.00016, %v374_v21  ;;  %vm538_vm3 = vcmp.eq.f32.partialorder %v2581_v36, inf  ;;  %vm540_vm4 = vcmp.eq.f32.partialorder %v2581_v36, 0.0 }
 0x184   : > { %v376_v22 = vpop.f32.mrf.mxu0  ;;  %v541_v5 = vand.u32 2147483648, %v2581_v36 }
 0x185   : > { %v2593_v41 = vadd.f32 0.00016, %v376_v22  ;;  %2101 = vrsqrt.f32 %v2589_v39  ;;  %vm545_vm5 = vcmp.eq.f32.partialorder %v2589_v39, inf  ;;  %v548_v8 = vand.u32 2147483648, %v2589_v39 }
 0x186   : > { %v380_v23 = vpop.f32.mrf.mxu0  ;;  %vm547_vm7 = vcmp.eq.f32.partialorder %v2589_v39, 0.0 }
 0x187   : > { %v2597_v43 = vadd.f32 0.00016, %v380_v23  ;;  %2103 = vrsqrt.f32 %v2593_v41  ;;  %v555_v12 = vand.u32 2147483648, %v2593_v41  ;;  %vm552_vm6 = vcmp.eq.f32.partialorder %v2593_v41, inf }
 0x188   : > { %v382_v24 = vpop.f32.mrf.mxu0  ;;  %vm554_vm12 = vcmp.eq.f32.partialorder %v2593_v41, 0.0 }
 0x189   : > { %v2600_v44 = vadd.f32 0.00016, %v382_v24  ;;  %2105 = vrsqrt.f32 %v2597_v43  ;;  %v562_v11 = vand.u32 2147483648, %v2597_v43  ;;  %vm559_vm9 = vcmp.eq.f32.partialorder %v2597_v43, inf }
 0x18a   : > { %v384_v25 = vpop.f32.mrf.mxu0  ;;  %vm561_vm14 = vcmp.eq.f32.partialorder %v2597_v43, 0.0 }
 0x18b   : > { %v2604_v46 = vadd.f32 0.00016, %v384_v25  ;;  %2107 = vrsqrt.f32 %v2600_v44  ;;  %v569_v15 = vand.u32 2147483648, %v2600_v44  ;;  %vm566_vm8 = vcmp.eq.f32.partialorder %v2600_v44, inf }
 0x18c   : > { %v386_v26 = vpop.f32.mrf.mxu0  ;;  %vm568_vm13 = vcmp.eq.f32.partialorder %v2600_v44, 0.0 }
 0x18d   : > { %v2607_v47 = vadd.f32 0.00016, %v386_v26  ;;  %2109 = vrsqrt.f32 %v2604_v46  ;;  %v576_v19 = vand.u32 2147483648, %v2604_v46  ;;  %vm573_vm11 = vcmp.eq.f32.partialorder %v2604_v46, inf }
 0x18e   : > { %v390_v27 = vpop.f32.mrf.mxu0  ;;  %v2098_v56 = vpop.eup %2097  ;;  %vm575_vm0 = vcmp.eq.f32.partialorder %v2604_v46, 0.0 }
 0x18f   : > { %v2610_v49 = vadd.f32 0.00016, %v390_v27  ;;  %2111 = vrsqrt.f32 %v2607_v47  ;;  %v530_v1 = vmul.f32 %v2098_v56, %v2579_v35  ;;  %vm580_vm10 = vcmp.eq.f32.partialorder %v2607_v47, inf }
 0x190   : > { %v392_v28 = vpop.f32.mrf.mxu0  ;;  %v2100_v59 = vpop.eup %2099  ;;  %v583_v25 = vand.u32 2147483648, %v2607_v47  ;;  %vm582_vm15 = vcmp.eq.f32.partialorder %v2607_v47, 0.0 }
 0x191   : > { %v2613_v50 = vadd.f32 0.00016, %v392_v28  ;;  %2113 = vrsqrt.f32 %v2610_v49  ;;  %v537_v4 = vmul.f32 %v2100_v59, %v2581_v36  ;;  %v532_v16 = vsel %vm531_vm1, %v2579_v35, %v530_v1 }
 0x192   : > { %v394_v29 = vpop.f32.mrf.mxu0  ;;  %v2102_v6 = vpop.eup %2101 }
 0x193   : > { %v2616_v52 = vadd.f32 0.00016, %v394_v29  ;;  %2115 = vrsqrt.f32 %v2613_v50  ;;  %v539_v20 = vsel %vm538_vm3, %v2581_v36, %v537_v4  ;;  %v544_v21 = vmul.f32 %v2102_v6, %v2589_v39 }
 0x194   : > { %v396_v30 = vpop.f32.mrf.mxu0  ;;  %v2104_v13 = vpop.eup %2103 }
 0x195   : > { %v2619_v53 = vadd.f32 0.00016, %v396_v30  ;;  %2117 = vrsqrt.f32 %v2616_v52  ;;  %v2690_v30 = vsel %vm533_vm2, %v534_v63, %v532_v16  ;;  %v546_v36 = vsel %vm545_vm5, %v2589_v39, %v544_v21 }
 0x196   : > { %v400_v31 = vpop.f32.mrf.mxu0  ;;  %v2106_v17 = vpop.eup %2105 }
 0x197   : > { %v2622_v55 = vadd.f32 0.00016, %v400_v31  ;;  %2119 = vrsqrt.f32 %v2619_v53 }
 0x198   : > { %v402_v32 = vpop.f32.mrf.mxu0  ;;  %v2108_v22 = vpop.eup %2107 }
 0x199   : > { %v2625_v57 = vadd.f32 0.00016, %v402_v32  ;;  %2121 = vrsqrt.f32 %v2622_v55 }
 0x19a   : > { %v404_v33 = vpop.f32.mrf.mxu0  ;;  %v2110_v26 = vpop.eup %2109 }
 0x19b   : > { %v2630_v60 = vadd.f32 0.00016, %v404_v33  ;;  %2123 = vrsqrt.f32 %v2625_v57 }
 0x19c   : > { %v406_v34 = vpop.f32.mrf.mxu0  ;;  %v2112_v31 = vpop.eup %2111 }
 0x19d   : > { %v2635_v61 = vadd.f32 0.00016, %v406_v34  ;;  %2125 = vrsqrt.f32 %v2630_v60  ;;  %v2700_v34 = vsel %vm540_vm4, %v541_v5, %v539_v20  ;;  %v579_v4 = vmul.f32 %v2112_v31, %v2607_v47 }
 0x19e   : > { %v2583_v37 = vpop.f32.mrf.mxu0  ;;  %v572_v5 = vmul.f32 %v2110_v26, %v2604_v46  ;;  %v2753_v20 = vsel %vm547_vm7, %v548_v8, %v546_v36 }
 0x19f   : > { %2127 = vrsqrt.f32 %v2635_v61  ;;  %v2724_v1 = vadd.f32 0.00016, %v2583_v37 }
 0x1a0   : > { %v2585_v38 = vpop.f32.mrf.mxu0  ;;  %v574_v31 = vsel %vm573_vm11, %v2604_v46, %v572_v5 }
 0x1a2   : > { %v2591_v40 = vpop.f32.mrf.mxu0 }
 0x1a3   : > { %v2771_v39 = vadd.f32 0.00016, %v2591_v40 }
 0x1a4   : > { %v2595_v42 = vpop.f32.mrf.mxu0 }
 0x1a6   : > { %v2602_v45 = vpop.f32.mrf.mxu0 }
 0x1a8   : > { %v422_v48 = vpop.f32.mrf.mxu0 }
 0x1a9   : > { %v2640_v0 = vadd.f32 0.00016, %v422_v48  ;;  %v2702_v48 = vpop.eup %2113 }
 0x1aa   : > { %v424_v51 = vpop.f32.mrf.mxu0  ;;  %v2714_v56 = vpop.eup %2115 }
 0x1ab   : > { %v2645_v2 = vadd.f32 0.00016, %v424_v51  ;;  %2129 = vrsqrt.f32 %v2640_v0  ;;  %v2721_v63 = vpop.eup %2117 }
 0x1ac   : > { %v426_v54 = vpop.f32.mrf.mxu0  ;;  %v2729_v6 = vpop.eup %2119 }
 0x1ad   : > { %v2650_v7 = vadd.f32 0.00016, %v426_v54  ;;  %2131 = vrsqrt.f32 %v2645_v2  ;;  %v551_v54 = vmul.f32 %v2104_v13, %v2593_v41  ;;  %v2738_v37 = vpop.eup %2121 }
 0x1ae   : > { %v2627_v58 = vpop.f32.mrf.mxu0  ;;  %v2755_v21 = vpop.eup %2123 }
 0x1af   : > { %2133 = vrsqrt.f32 %v2650_v7  ;;  %v2705_v35 = vadd.f32 0.00016, %v2627_v58  ;;  %v565_v58 = vmul.f32 %v2108_v22, %v2600_v44  ;;  %v2758_v22 = vadd.f32 0.00016, %v2585_v38 }
 0x1b0   : > { %v432_v62 = vpop.f32.mrf.mxu0  ;;  %v581_v38 = vsel %vm580_vm10, %v2607_v47, %v579_v4  ;;  %vm692_vm7 = vcmp.eq.f32.partialorder %v2650_v7, inf }
 0x1b1   : > { %v2655_v9 = vadd.f32 0.00016, %v432_v62  ;;  %v558_v62 = vmul.f32 %v2106_v17, %v2597_v43  ;;  %v2741_v17 = vadd.f32 0.00016, %v2602_v45  ;;  %v567_v45 = vsel %vm566_vm8, %v2600_v44, %v565_v58 }
 0x1b2   : > { %v434_v3 = vpop.f32.mrf.mxu0  ;;  %v570_v4 = vsel %vm568_vm13, %v569_v15, %v567_v45  ;;  %v577_v44 = vsel %vm575_vm0, %v576_v19, %v574_v31  ;;  %vm699_vm10 = vcmp.eq.f32.partialorder %v2705_v35, inf  ;;  %vm680_vm0 = vcmp.eq.f32.partialorder %v2640_v0, 0.0 }
 0x1b3   : > { %2135 = vrsqrt.f32 %v2655_v9  ;;  %v2684_v27 = vadd.f32 0.00016, %v434_v3  ;;  %v560_v26 = vsel %vm559_vm9, %v2597_v43, %v558_v62  ;;  %vm706_vm1 = vcmp.eq.f32.partialorder %v2655_v9, inf }
 0x1b4   : > { %v436_v10 = vpop.f32.mrf.mxu0  ;;  %v563_v5 = vsel %vm561_vm14, %v562_v11, %v560_v26  ;;  %vm708_vm9 = vcmp.eq.f32.partialorder %v2655_v9, 0.0 }
 0x1b5   : > { %v2660_v14 = vadd.f32 0.00016, %v436_v10  ;;  %v2732_v10 = vadd.f32 0.00016, %v2595_v42  ;;  %v553_v42 = vsel %vm552_vm6, %v2593_v41, %v551_v54  ;;  %vm713_vm5 = vcmp.eq.f32.partialorder %v2684_v27, inf }
 0x1b6   : > { %v440_v18 = vpop.f32.mrf.mxu0  ;;  %v556_v40 = vsel %vm554_vm12, %v555_v12, %v553_v42  ;;  %v584_v12 = vsel %vm582_vm15, %v583_v25, %v581_v38  ;;  %vm657_vm15 = vcmp.eq.f32.partialorder %v2771_v39, inf }
 0x1b7   : > { %v2677_v23 = vadd.f32 0.00016, %v440_v18  ;;  %2137 = vrsqrt.f32 %v2660_v14  ;;  %v2827_v36 = vpack.c.bf16 %v584_v12, %v570_v4  ;;  %vm720_vm3 = vcmp.eq.f32.partialorder %v2660_v14, inf }
 0x1b8   : > { %v442_v28 = vpop.f32.mrf.mxu0  ;;  %vm722_vm4 = vcmp.eq.f32.partialorder %v2660_v14, 0.0  ;;  %v2839_v4 = vpack.c.bf16 %v577_v44, %v563_v5  ;;  %v2842_v12 = vpack.c.bf16 %v556_v40, %v2700_v34  ;;  %v2861_v40 = vpack.c.bf16 %v2753_v20, %v2690_v30 }
 0x1b9   : > { %v2693_v32 = vadd.f32 0.00016, %v442_v28  ;;  %2139 = vrsqrt.f32 %v2677_v23  ;;  %v2767_v28 = vpop.eup %2125  ;;  %3765 = vst [vmem:[#allocation13_spill] sm:$0xff] %v2827_v36  ;;  %vm727_vm2 = vcmp.eq.f32.partialorder %v2677_v23, inf  ;;  %vm729_vm6 = vcmp.eq.f32.partialorder %v2677_v23, 0.0 }
 0x1ba   : > { %v444_v51 = vpop.f32.mrf.mxu0  ;;  %3766 = vst [vmem:[#allocation14_spill] sm:$0xff] %v2839_v4  ;;  %3767 = vst [vmem:[#allocation15_spill] sm:$0xff] %v2842_v12 }
 0x1bb   : > { %2141 = vrsqrt.f32 %v2693_v32  ;;  %v2717_v59 = vadd.f32 0.00016, %v444_v51  ;;  %v2781_v51 = vpop.eup %2127  ;;  %vm734_vm8 = vcmp.eq.f32.partialorder %v2693_v32, inf  ;;  %vm736_vm11 = vcmp.eq.f32.partialorder %v2693_v32, 0.0  ;;  %3768 = vst [vmem:[#allocation16_spill] sm:$0xff] %v2861_v40 }
 0x1bc   : > { %2143 = vrsqrt.f32 %v2684_v27  ;;  %v446_v3 = vpop.f32.mrf.mxu0  ;;  %v2130_v58 = vpop.eup %2129  ;;  %v737_v34 = vand.u32 2147483648, %v2693_v32 }
 0x1bd   : > { %2145 = vrsqrt.f32 %v2717_v59  ;;  %v2735_v13 = vadd.f32 0.00016, %v446_v3  ;;  %v2132_v24 = vpop.eup %2131  ;;  %v2850_v25 = vmul.f32 %v2130_v58, %v2640_v0  ;;  %vm741_vm14 = vcmp.eq.f32.partialorder %v2717_v59, inf }
 0x1be   : > { %2147 = vrsqrt.f32 %v2705_v35  ;;  %v2744_v18 = vpop.f32.mrf.mxu0  ;;  %v2134_v15 = vpop.eup %2133  ;;  %v2868_v38 = vmul.f32 %v2132_v24, %v2645_v2  ;;  %vm743_vm13 = vcmp.eq.f32.partialorder %v2717_v59, 0.0  ;;  %v744_v30 = vand.u32 2147483648, %v2717_v59 }
 0x1bf   : > { %2149 = vrsqrt.f32 %v2735_v13  ;;  %vm748_vm12 = vcmp.eq.f32.partialorder %v2735_v13, inf  ;;  %v751_v40 = vand.u32 2147483648, %v2735_v13 }
 0x1c0   : > { %2151 = vrsqrt.f32 %v2724_v1  ;;  %v2773_v8 = vpop.f32.mrf.mxu0  ;;  %v2136_v26 = vpop.eup %2135 }
 0x1c1   : > { %2153 = vrsqrt.f32 %v2732_v10 }
 0x1c2   : > { %2155 = vrsqrt.f32 %v2741_v17  ;;  %v2791_v62 = vpop.f32.mrf.mxu0 }
 0x1c3   : > { %2157 = vrsqrt.f32 %v2758_v22 }
 0x1c4   : > { %2159 = vrsqrt.f32 %v2771_v39  ;;  %v2813_v43 = vpop.f32.mrf.mxu0  ;;  %v2138_v19 = vpop.eup %2137 }
 0x1c5   : > { %v719_v42 = vmul.f32 %v2138_v19, %v2660_v14  ;;  %v705_v19 = vmul.f32 %v2136_v26, %v2655_v9 }
 0x1c6   : > { %v2822_v31 = vpop.f32.mrf.mxu0  ;;  %v2140_v16 = vpop.eup %2139 }
 0x1c7   : > { %v721_v3 = vsel %vm720_vm3, %v2660_v14, %v719_v42  ;;  %vm650_vm3 = vcmp.eq.f32.partialorder %v2758_v22, inf  ;;  %v707_v4 = vsel %vm706_vm1, %v2655_v9, %v705_v19  ;;  %vm636_vm1 = vcmp.eq.f32.partialorder %v2635_v61, inf }
 0x1c8   : > { %v2142_v54 = vpop.eup %2141  ;;  %v2834_v45 = vpop.f32.mrf.mxu0 }
 0x1c9   : > { %v2144_v11 = vpop.eup %2143  ;;  %v733_v46 = vmul.f32 %v2142_v54, %v2693_v32  ;;  %v726_v54 = vmul.f32 %v2140_v16, %v2677_v23 }
 0x1ca   : > { %v2146_v47 = vpop.eup %2145  ;;  %v2852_v5 = vpop.f32.mrf.mxu0  ;;  %v712_v20 = vmul.f32 %v2144_v11, %v2684_v27 }
 0x1cb   : > { %v2148_v44 = vpop.eup %2147  ;;  %v740_v58 = vmul.f32 %v2146_v47, %v2717_v59  ;;  %v691_v47 = vmul.f32 %v2134_v15, %v2650_v7  ;;  %v735_v24 = vsel %vm734_vm8, %v2693_v32, %v733_v46  ;;  %v728_v46 = vsel %vm727_vm2, %v2677_v23, %v726_v54 }
 0x1cc   : > { %v2150_v16 = vpop.eup %2149  ;;  %v2871_v29 = vpop.f32.mrf.mxu0  ;;  %vm687_vm8 = vcmp.eq.f32.partialorder %v2645_v2, 0.0  ;;  %vm666_vm2 = vcmp.eq.f32.partialorder %v2732_v10, 0.0  ;;  %v738_v36 = vsel %vm736_vm11, %v737_v34, %v735_v24  ;;  %vm3777_vm11 = vcmp.eq.f32.partialorder %v2684_v27, 0.0 }
 0x1cd   : > { %v2878_v26 = vpop.eup %2151  ;;  %v747_v33 = vmul.f32 %v2150_v16, %v2735_v13  ;;  %v742_v41 = vsel %vm741_vm14, %v2717_v59, %v740_v58  ;;  %v698_v58 = vmul.f32 %v2148_v44, %v2705_v35  ;;  %vm750_vm14 = vcmp.eq.f32.partialorder %v2735_v13, 0.0 }
 0x1ce   : > { %v2154_v15 = vpop.eup %2153  ;;  %v2890_v11 = vpop.f32.mrf.mxu0  ;;  %v745_v12 = vsel %vm743_vm13, %v744_v30, %v742_v41  ;;  %v714_v41 = vsel %vm713_vm5, %v2684_v27, %v712_v20  ;;  %v693_v34 = vsel %vm692_vm7, %v2650_v7, %v691_v47  ;;  %vm643_vm5 = vcmp.eq.f32.partialorder %v2724_v1, inf }
 0x1cf   : > { %v2156_v42 = vpop.eup %2155  ;;  %v749_v16 = vsel %vm748_vm12, %v2735_v13, %v747_v33  ;;  %v3770_v13 = vand.u32 2147483648, %v2660_v14  ;;  %v663_v14 = vmul.f32 %v2154_v15, %v2732_v10  ;;  %v700_v20 = vsel %vm699_vm10, %v2705_v35, %v698_v58 }
 0x1d0   : > { %v2158_v54 = vpop.eup %2157  ;;  %v2909_v44 = vpop.f32.mrf.mxu0  ;;  %v752_v33 = vsel %vm750_vm14, %v751_v40, %v749_v16  ;;  %v670_v47 = vmul.f32 %v2156_v42, %v2741_v17  ;;  %vm622_vm7 = vcmp.eq.f32.partialorder %v2625_v57, inf  ;;  %vm638_vm10 = vcmp.eq.f32.partialorder %v2635_v61, 0.0 }
 0x1d1   : > { %3769 = vst [vmem:[#allocation17_spill] sm:$0xff] %v2909_v44  ;;  %v724_v59 = vsel %vm722_vm4, %v3770_v13, %v721_v3  ;;  %v2160_v19 = vpop.eup %2159  ;;  %v2921_v30 = vpack.c.bf16 %v752_v33, %v738_v36  ;;  %v3772_v44 = vand.u32 2147483648, %v2677_v23  ;;  %vm652_vm4 = vcmp.eq.f32.partialorder %v2758_v22, 0.0 }
 0x1d2   : > { %v2933_v3 = vpop.f32.mrf.mxu0  ;;  %v3774_v36 = vand.u32 2147483648, %v2655_v9  ;;  %v649_v15 = vmul.f32 %v2158_v54, %v2758_v22  ;;  %vm701_vm13 = vcmp.eq.f32.partialorder %v2705_v35, 0.0  ;;  %vm3780_vm14 = vcmp.eq.f32.partialorder %v2650_v7, 0.0 }
 0x1d3   : > { %3771 = vst [vmem:[#allocation18_spill] sm:$0xff] %v2921_v30  ;;  %v731_v32 = vsel %vm729_vm6, %v3772_v44, %v728_v46  ;;  %vm659_vm6 = vcmp.eq.f32.partialorder %v2771_v39, 0.0  ;;  %1227 = vmatprep.subr.bf16.mxu1 %v2921_v30  ;;  %v656_v42 = vmul.f32 %v2160_v19, %v2771_v39  ;;  %v3782_v16 = vand.u32 2147483648, %v2705_v35 }
 0x1d4   : > { %v2935_v40 = vpack.c.bf16 %v745_v12, %v731_v32  ;;  %v710_v23 = vsel %vm708_vm9, %v3774_v36, %v707_v4  ;;  %v3776_v12 = vand.u32 2147483648, %v2684_v27  ;;  %vm3778_vm9 = vcmp.eq.f32.partialorder %v2640_v0, inf  ;;  %v2961_v46 = vpop.f32.mrf.mxu0 }
 0x1d5   : > { %v2948_v24 = vpack.c.bf16 %v724_v59, %v710_v23  ;;  %v679_v4 = vsel %vm3778_vm9, %v2640_v0, %v2850_v25  ;;  %v3779_v27 = vand.u32 2147483648, %v2650_v7  ;;  %vm608_vm9 = vcmp.eq.f32.partialorder %v2619_v53, inf }
 0x1d6   : > { %3773 = vst [vmem:[#allocation19_spill] sm:$0xff] %v2935_v40  ;;  %v717_v9 = vsel %vm3777_vm11, %v3776_v12, %v714_v41  ;;  %1228 = vmatpush1.bf16.msra.mxu1 %v2935_v40  ;;  %vm3781_vm11 = vcmp.eq.f32.partialorder %v2645_v2, inf  ;;  %v703_v54 = vsel %vm701_vm13, %v3782_v16, %v700_v20  ;;  %v688_v44 = vand.u32 2147483648, %v2645_v2  ;;  %v2986_v33 = vpop.f32.mrf.mxu0 }
 0x1d7   : > { %3775 = vst [vmem:[#allocation20_spill] sm:$0xff] %v2948_v24  ;;  %v696_v58 = vsel %vm3780_vm14, %v3779_v27, %v693_v34  ;;  %v686_v25 = vsel %vm3781_vm11, %v2645_v2, %v2868_v38  ;;  %1229 = vmatprep.subr.bf16.mxu1 %v2948_v24  ;;  %vm3783_vm12 = vcmp.eq.f32.partialorder %v2732_v10, inf  ;;  %vm624_vm14 = vcmp.eq.f32.partialorder %v2625_v57, 0.0 }
 0x1d8   : > { %v665_v7 = vsel %vm3783_vm12, %v2732_v10, %v663_v14  ;;  %v635_v38 = vmul.f32 %v2781_v51, %v2635_v61  ;;  %v2988_v13 = vpack.c.bf16 %v717_v9, %v703_v54  ;;  %v3785_v35 = vand.u32 2147483648, %v2640_v0 }
 0x1d9   : > { %vm3786_vm13 = vcmp.eq.f32.partialorder %v2741_v17, inf  ;;  %v642_v19 = vmul.f32 %v2878_v26, %v2724_v1  ;;  %vm631_vm12 = vcmp.eq.f32.partialorder %v2630_v60, 0.0  ;;  %v689_v32 = vsel %vm687_vm8, %v688_v44, %v686_v25  ;;  %v3012_v26 = vpop.f32.mrf.mxu0 }
 0x1da   : > { %3784 = vst [vmem:[#allocation21_spill] sm:$0xff] %v2988_v13  ;;  %v682_v59 = vsel %vm680_vm0, %v3785_v35, %v679_v4  ;;  %v672_v41 = vsel %vm3786_vm13, %v2741_v17, %v670_v47  ;;  %v651_v0 = vsel %vm650_vm3, %v2758_v22, %v649_v15  ;;  %v621_v34 = vmul.f32 %v2755_v21, %v2625_v57 }
 0x1db   : > { %v3001_v51 = vpack.c.bf16 %v696_v58, %v682_v59  ;;  %vm610_vm0 = vcmp.eq.f32.partialorder %v2619_v53, 0.0  ;;  %vm601_vm13 = vcmp.eq.f32.partialorder %v2616_v52, inf  ;;  %1230 = vmatpush1.bf16.msra.mxu1 %v2988_v13  ;;  %vm673_vm11 = vcmp.eq.f32.partialorder %v2741_v17, 0.0  ;;  %v3036_v9 = vpop.f32.mrf.mxu0 }
 0x1dc   : > { %v3788_v2 = vand.u32 2147483648, %v2732_v10  ;;  %v658_v36 = vsel %vm657_vm15, %v2771_v39, %v656_v42  ;;  %v628_v21 = vmul.f32 %v2767_v28, %v2630_v60  ;;  %vm587_vm8 = vcmp.eq.f32.partialorder %v2610_v49, inf }
 0x1dd   : > { %3787 = vst [vmem:[#allocation22_spill] sm:$0xff] %v3001_v51  ;;  %1231 = vmatprep.subr.bf16.mxu1 %v3001_v51  ;;  %v3789_v23 = vand.u32 2147483648, %v2741_v17  ;;  %v660_v47 = vand.u32 2147483648, %v2771_v39  ;;  %v637_v10 = vsel %vm636_vm1, %v2635_v61, %v635_v38  ;;  %vm596_vm3 = vcmp.eq.f32.partialorder %v2613_v50, 0.0  ;;  %v3059_v42 = vpop.f32.mrf.mxu0 }
 0x1de   : > { %v668_v14 = vsel %vm666_vm2, %v3788_v2, %v665_v7  ;;  %v607_v12 = vmul.f32 %v2729_v6, %v2619_v53  ;;  %v3791_v4 = vand.u32 2147483648, %v2758_v22  ;;  %v644_v15 = vsel %vm643_vm5, %v2724_v1, %v642_v19 }
 0x1df   : > { %v675_v20 = vsel %vm673_vm11, %v3789_v23, %v672_v41  ;;  %v614_v27 = vmul.f32 %v2738_v37, %v2622_v55  ;;  %vm603_vm15 = vcmp.eq.f32.partialorder %v2616_v52, 0.0  ;;  %v661_v6 = vsel %vm659_vm6, %v660_v47, %v658_v36  ;;  %v3086_v59 = vpop.f32.mrf.mxu0 }
 0x1e0   : > { %v3038_v28 = vpack.c.bf16 %v689_v32, %v675_v20  ;;  %v654_v17 = vsel %vm652_vm4, %v3791_v4, %v651_v0  ;;  %v623_v25 = vsel %vm622_vm7, %v2625_v57, %v621_v34  ;;  %v593_v22 = vmul.f32 %v2714_v56, %v2613_v50 }
 0x1e1   : > { %v3050_v58 = vpack.c.bf16 %v668_v14, %v654_v17  ;;  %vm645_vm2 = vcmp.eq.f32.partialorder %v2724_v1, 0.0  ;;  %v3793_v37 = vand.u32 2147483648, %v2635_v61  ;;  %vm3794_vm1 = vcmp.eq.f32.partialorder %v2630_v60, inf  ;;  %v3112_v34 = vpop.f32.mrf.mxu0 }
 0x1e2   : > { %3790 = vst [vmem:[#allocation23_spill] sm:$0xff] %v3038_v28  ;;  %1232 = vmatpush1.bf16.msra.mxu1 %v3038_v28  ;;  %v630_v39 = vsel %vm3794_vm1, %v2630_v60, %v628_v21  ;;  %v600_v54 = vmul.f32 %v2721_v63, %v2616_v52  ;;  %v3073_v56 = vadd.f32 0.00016, %v2744_v18  ;;  %v3795_v44 = vand.u32 2147483648, %v2724_v1 }
 0x1e3   : > { %3792 = vst [vmem:[#allocation24_spill] sm:$0xff] %v3050_v58  ;;  %v640_v16 = vsel %vm638_vm10, %v3793_v37, %v637_v10  ;;  %1233 = vmatprep.subr.bf16.mxu1 %v3050_v58  ;;  %v609_v61 = vsel %vm608_vm9, %v2619_v53, %v607_v12  ;;  %v586_v38 = vmul.f32 %v2702_v48, %v2610_v49  ;;  %v3084_v35 = vadd.f32 0.00016, %v2773_v8  ;;  %v3137_v23 = vpop.f32.mrf.mxu0  ;;  %v3811_v37 = vld [vmem:[#allocation13_spill] sm:$0xff] }
 0x1e4   : > { %v647_v7 = vsel %vm645_vm2, %v3795_v44, %v644_v15  ;;  %v3797_v18 = vand.u32 2147483648, %v2625_v57  ;;  %vm3798_vm4 = vcmp.eq.f32.partialorder %v2622_v55, inf  ;;  %v3098_v19 = vadd.f32 0.00016, %v2791_v62  ;;  %v3809_v15 = vld [vmem:[#allocation17_spill] sm:$0xff] }
 0x1e5   : > { %v3088_v63 = vpack.c.bf16 %v661_v6, %v647_v7  ;;  %v616_v41 = vsel %vm3798_vm4, %v2622_v55, %v614_v27  ;;  %v3800_v8 = vand.u32 2147483648, %v2630_v60  ;;  %vm3801_vm5 = vcmp.eq.f32.partialorder %v2613_v50, inf  ;;  %v496_v17 = vpop.f32.mrf.mxu0 }
 0x1e6   : > { %v626_v1 = vsel %vm624_vm14, %v3797_v18, %v623_v25  ;;  %v595_v0 = vsel %vm3801_vm5, %v2613_v50, %v593_v22  ;;  %v3110_v57 = vadd.f32 0.00016, %v2813_v43  ;;  %vm617_vm6 = vcmp.eq.f32.partialorder %v2622_v55, 0.0 }
 0x1e7   : > { %3796 = vst [vmem:[#allocation25_spill] sm:$0xff] %v3088_v63  ;;  %v3100_v48 = vpack.c.bf16 %v640_v16, %v626_v1  ;;  %v633_v32 = vsel %vm631_vm12, %v3800_v8, %v630_v39  ;;  %1234 = vmatpush1.bf16.msra.mxu1 %v3088_v63  ;;  %v3802_v62 = vand.u32 2147483648, %v2619_v53  ;;  %v602_v60 = vsel %vm601_vm13, %v2616_v52, %v600_v54  ;;  %v3172_v27 = vpop.f32.mrf.mxu0  ;;  %v3812_v54 = vld [vmem:[#allocation14_spill] sm:$0xff] }
 0x1e8   : > { %2161 = vrsqrt.f32 %v3073_v56  ;;  %v3125_v43 = vadd.f32 0.00016, %v2822_v31  ;;  %v3803_v14 = vand.u32 2147483648, %v2622_v55  ;;  %v588_v21 = vsel %vm587_vm8, %v2610_v49, %v586_v38 }
 0x1e9   : > { %3799 = vst [vmem:[#allocation26_spill] sm:$0xff] %v3100_v48  ;;  %v612_v2 = vsel %vm610_vm0, %v3802_v62, %v609_v61  ;;  %1235 = vmatprep.subr.bf16.mxu1 %v3100_v48  ;;  %2163 = vrsqrt.f32 %v3084_v35  ;;  %v3135_v53 = vadd.f32 0.00016, %v2834_v45  ;;  %v3805_v31 = vand.u32 2147483648, %v2613_v50 }
 0x1ea   : > { %v619_v36 = vsel %vm617_vm6, %v3803_v14, %v616_v41  ;;  %2165 = vrsqrt.f32 %v3098_v19  ;;  %v3147_v55 = vadd.f32 0.00016, %v2852_v5  ;;  %v3807_v12 = vand.u32 2147483648, %v2616_v52  ;;  %v3814_v41 = vld [vmem:[#allocation16_spill] sm:$0xff] }
 0x1eb   : > { %v3139_v20 = vpack.c.bf16 %v633_v32, %v619_v36  ;;  %v598_v47 = vsel %vm596_vm3, %v3805_v31, %v595_v0  ;;  %2167 = vrsqrt.f32 %v3110_v57  ;;  %v3157_v4 = vadd.f32 0.00016, %v2871_v29 }
 0x1ec   : > { %v3149_v10 = vpack.c.bf16 %v612_v2, %v598_v47  ;;  %v605_v45 = vsel %vm603_vm15, %v3807_v12, %v602_v60  ;;  %vm589_vm7 = vcmp.eq.f32.partialorder %v2610_v49, 0.0  ;;  %2169 = vrsqrt.f32 %v3125_v43 }
 0x1ed   : > { %3804 = vst [vmem:[#allocation27_spill] sm:$0xff] %v3139_v20  ;;  %1236 = vmatpush1.bf16.msra.mxu1 %v3139_v20  ;;  %v3163_v50 = vadd.f32 0.00016, %v2890_v11  ;;  %v3808_v52 = vand.u32 2147483648, %v2610_v49  ;;  %2171 = vrsqrt.f32 %v3135_v53  ;;  %v3170_v29 = vadd.f32 0.00016, %v3809_v15  ;;  %v502_v49 = vpop.f32.mrf.mxu0 }
 0x1ee   : > { %3806 = vst [vmem:[#allocation28_spill] sm:$0xff] %v3149_v10  ;;  %1237 = vmatprep.subr.bf16.mxu1 %v3149_v10  ;;  %2173 = vrsqrt.f32 %v3147_v55  ;;  %v3178_v25 = vadd.f32 0.00016, %v2933_v3  ;;  %v3182_v11 = vadd.f32 0.00016, %v2961_v46  ;;  %vm790_vm10 = vcmp.eq.f32.partialorder %v3135_v53, inf }
 0x1ef   : > { %v591_v5 = vsel %vm589_vm7, %v3808_v52, %v588_v21  ;;  %2175 = vrsqrt.f32 %v3157_v4  ;;  %v3187_v22 = vadd.f32 0.00016, %v2986_v33  ;;  %v3192_v3 = vadd.f32 0.00016, %v3012_v26  ;;  %v504_v16 = vpop.f32.mrf.mxu0  ;;  %v3813_v26 = vld [vmem:[#allocation15_spill] sm:$0xff] }
 0x1f0   : > { %v3174_v6 = vpack.c.bf16 %v605_v45, %v591_v5  ;;  %2177 = vrsqrt.f32 %v3163_v50  ;;  %v3196_v46 = vadd.f32 0.00016, %v3036_v9  ;;  %v3200_v39 = vadd.f32 0.00016, %v3059_v42 }
 0x1f1   : > { %2179 = vrsqrt.f32 %v3170_v29  ;;  %v506_v33 = vpop.f32.mrf.mxu0  ;;  %v3204_v44 = vadd.f32 0.00016, %v496_v17  ;;  %v3210_v9 = vadd.f32 0.00016, %v502_v49  ;;  %v3213_v42 = vadd.f32 0.00016, %v504_v16 }
 0x1f2   : > { %3810 = vst [vmem:[#allocation17_spill] sm:$0xff] %v3174_v6  ;;  %1238 = vmatpush1.bf16.msra.mxu1 %v3174_v6  ;;  %2181 = vrsqrt.f32 %v3178_v25  ;;  %v3220_v32 = vadd.f32 0.00016, %v506_v33  ;;  %v3226_v60 = vadd.f32 0.00016, %v3086_v59  ;;  %vm783_vm9 = vcmp.eq.f32.partialorder %v3125_v43, inf }
 0x1f3   : > { %1239 = vmatprep.subr.bf16.mxu1 %v3811_v37  ;;  %2183 = vrsqrt.f32 %v3182_v11  ;;  %v510_v61 = vpop.f32.mrf.mxu0  ;;  %vm804_vm14 = vcmp.eq.f32.partialorder %v3157_v4, inf  ;;  %v786_v47 = vand.u32 2147483648, %v3125_v43  ;;  %vm785_vm11 = vcmp.eq.f32.partialorder %v3125_v43, 0.0 }
 0x1f4   : > { %2185 = vrsqrt.f32 %v3187_v22  ;;  %v3236_v12 = vadd.f32 0.00016, %v510_v61  ;;  %vm797_vm12 = vcmp.eq.f32.partialorder %v3147_v55, inf  ;;  %v800_v17 = vand.u32 2147483648, %v3147_v55 }
 0x1f5   : > { %v3207_v7 = vpop.eup %2161  ;;  %2187 = vrsqrt.f32 %v3192_v3  ;;  %v512_v1 = vpop.f32.mrf.mxu0  ;;  %vm792_vm0 = vcmp.eq.f32.partialorder %v3135_v53, 0.0  ;;  %vm799_vm13 = vcmp.eq.f32.partialorder %v3147_v55, 0.0  ;;  %vm762_vm8 = vcmp.eq.f32.partialorder %v3084_v35, inf }
 0x1f6   : > { %1240 = vmatpush1.bf16.msra.mxu1 %v3812_v54  ;;  %v2164_v38 = vpop.eup %2163  ;;  %2189 = vrsqrt.f32 %v3196_v46  ;;  %v3222_v0 = vadd.f32 0.00016, %v512_v1  ;;  %vm806_vm3 = vcmp.eq.f32.partialorder %v3157_v4, 0.0  ;;  %vm764_vm15 = vcmp.eq.f32.partialorder %v3084_v35, 0.0 }
 0x1f7   : > { %1241 = vmatprep.subr.bf16.mxu1 %v3813_v26  ;;  %v3215_v18 = vpop.eup %2165  ;;  %2191 = vrsqrt.f32 %v3200_v39  ;;  %v514_v14 = vpop.f32.mrf.mxu0  ;;  %v761_v36 = vmul.f32 %v2164_v38, %v3084_v35  ;;  %v765_v38 = vand.u32 2147483648, %v3084_v35  ;;  %vm776_vm2 = vcmp.eq.f32.partialorder %v3110_v57, inf }
 0x1f8   : > { %v2168_v8 = vpop.eup %2167  ;;  %2193 = vrsqrt.f32 %v3204_v44  ;;  %v3243_v5 = vadd.f32 0.00016, %v514_v14  ;;  %vm930_vm1 = vcmp.eq.f32.partialorder %v3222_v0, inf  ;;  %v2393_v24 = vmov 1966171168  }
 0x1f9   : > { %v2170_v2 = vpop.eup %2169  ;;  %2195 = vrsqrt.f32 %v3210_v9  ;;  %v516_v45 = vpop.f32.mrf.mxu0  ;;  %v763_v61 = vsel %vm762_vm8, %v3084_v35, %v761_v36  ;;  %v775_v37 = vmul.f32 %v2168_v8, %v3110_v57  ;;  %v3305_v8 = vadd.f32 0.00016, %v3172_v27 }
 0x1fa   : > { %1242 = vmatpush1.bf16.msra.mxu1 %v3814_v41  ;;  %v2172_v21 = vpop.eup %2171  ;;  %2197 = vrsqrt.f32 %v3213_v42  ;;  %v3245_v15 = vadd.f32 0.00016, %v516_v45  ;;  %v782_v33 = vmul.f32 %v2170_v2, %v3125_v43  ;;  %v3267_v41 = vadd.f32 0.00016, %v3112_v34 }
 0x1fb   : > { %v2174_v59 = vpop.eup %2173  ;;  %2199 = vrsqrt.f32 %v3222_v0  ;;  %v520_v16 = vpop.f32.mrf.mxu0  ;;  %v789_v45 = vmul.f32 %v2172_v21, %v3135_v53  ;;  %v3283_v34 = vadd.f32 0.00016, %v3137_v23  ;;  %vm755_vm8 = vcmp.eq.f32.partialorder %v3073_v56, inf }
 0x1fc   : > { %v2176_v52 = vpop.eup %2175  ;;  %2201 = vrsqrt.f32 %v3220_v32  ;;  %v3260_v14 = vadd.f32 0.00016, %v520_v16  ;;  %v796_v31 = vmul.f32 %v2174_v59, %v3147_v55  ;;  %v3278_v59 = vsel %vm764_vm15, %v765_v38, %v763_v61 }
 0x1fd   : > { %v3250_v49 = vpop.eup %2177  ;;  %2203 = vrsqrt.f32 %v3226_v60  ;;  %v522_v2 = vpop.f32.mrf.mxu0  ;;  %v803_v36 = vmul.f32 %v2176_v52, %v3157_v4  ;;  %v784_v35 = vsel %vm783_vm9, %v3125_v43, %v782_v33  ;;  %v791_v23 = vsel %vm790_vm10, %v3135_v53, %v789_v45 }
 0x1fe   : > { %v3257_v1 = vpop.eup %2179  ;;  %2205 = vrsqrt.f32 %v3245_v15  ;;  %v3275_v16 = vadd.f32 0.00016, %v522_v2  ;;  %v798_v38 = vsel %vm797_vm12, %v3147_v55, %v796_v31  ;;  %v787_v10 = vsel %vm785_vm11, %v786_v47, %v784_v35 }
 0x1ff   : > { %v3264_v62 = vpop.eup %2181  ;;  %2207 = vrsqrt.f32 %v3236_v12  ;;  %v524_v52 = vpop.f32.mrf.mxu0  ;;  %v801_v63 = vsel %vm799_vm13, %v800_v17, %v798_v38  ;;  %v3816_v47 = vand.u32 2147483648, %v3157_v4  ;;  %vm944_vm4 = vcmp.eq.f32.partialorder %v3245_v15, inf }
 0x200   : > { %v3272_v26 = vpop.eup %2183  ;;  %2209 = vrsqrt.f32 %v3243_v5  ;;  %v3293_v61 = vadd.f32 0.00016, %v524_v52  ;;  %v805_v52 = vsel %vm804_vm14, %v3157_v4, %v803_v36  ;;  %v3815_v36 = vand.u32 2147483648, %v3135_v53 }
 0x201   : > { %v3280_v54 = vpop.eup %2185  ;;  %2211 = vrsqrt.f32 %v3260_v14  ;;  %v526_v33 = vpop.f32.mrf.mxu0  ;;  %v808_v35 = vsel %vm806_vm3, %v3816_v47, %v805_v52  ;;  %vm958_vm5 = vcmp.eq.f32.partialorder %v3275_v16, inf  ;;  %vm951_vm6 = vcmp.eq.f32.partialorder %v3260_v14, inf }
 0x202   : > { %v3290_v2 = vpop.eup %2187  ;;  %2213 = vrsqrt.f32 %v3275_v16  ;;  %v3314_v45 = vadd.f32 0.00016, %v526_v33  ;;  %v794_v48 = vsel %vm792_vm0, %v3815_v36, %v791_v23  ;;  %vm965_vm7 = vcmp.eq.f32.partialorder %v3293_v61, inf }
 0x203   : > { %v3301_v21 = vpop.eup %2189  ;;  %2215 = vrsqrt.f32 %v3267_v41  ;;  %v3360_v47 = vpack.c.bf16 %v808_v35, %v794_v48  ;;  %vm937_vm10 = vcmp.eq.f32.partialorder %v3243_v5, inf  ;;  %vm967_vm14 = vcmp.eq.f32.partialorder %v3293_v61, 0.0 }
 0x204   : > { %v3311_v6 = vpop.eup %2191  ;;  %2217 = vrsqrt.f32 %v3293_v61  ;;  %vm972_vm9 = vcmp.eq.f32.partialorder %v3314_v45, inf  ;;  %vm946_vm11 = vcmp.eq.f32.partialorder %v3245_v15, 0.0  ;;  %v754_v35 = vmul.f32 %v3207_v7, %v3073_v56 }
 0x205   : > { %v2194_v27 = vpop.eup %2193  ;;  %2219 = vrsqrt.f32 %v3283_v34  ;;  %vm960_vm12 = vcmp.eq.f32.partialorder %v3275_v16, 0.0  ;;  %vm974_vm0 = vcmp.eq.f32.partialorder %v3314_v45, 0.0  ;;  %vm778_vm13 = vcmp.eq.f32.partialorder %v3110_v57, 0.0 }
 0x206   : > { %v2196_v33 = vpop.eup %2195  ;;  %2221 = vrsqrt.f32 %v3314_v45  ;;  %v3346_v31 = vmul.f32 %v2194_v27, %v3204_v44  ;;  %v3362_v27 = vpack.c.bf16 %v801_v63, %v787_v10  ;;  %v779_v10 = vand.u32 2147483648, %v3110_v57 }
 0x207   : > { %v2198_v20 = vpop.eup %2197  ;;  %2223 = vrsqrt.f32 %v3305_v8  ;;  %v3354_v36 = vmul.f32 %v2196_v33, %v3210_v9  ;;  %v756_v53 = vsel %vm755_vm8, %v3073_v56, %v754_v35  ;;  %vm757_vm8 = vcmp.eq.f32.partialorder %v3073_v56, 0.0 }
 0x208   : > { %v2200_v23 = vpop.eup %2199  ;;  %v3358_v52 = vmul.f32 %v2198_v20, %v3213_v42  ;;  %v777_v20 = vsel %vm776_vm2, %v3110_v57, %v775_v37  ;;  %v975_v37 = vand.u32 2147483648, %v3314_v45  ;;  %vm769_vm15 = vcmp.eq.f32.partialorder %v3098_v19, inf }
 0x209   : > { %v2202_v4 = vpop.eup %2201  ;;  %v929_v38 = vmul.f32 %v2200_v23, %v3222_v0  ;;  %v780_v17 = vsel %vm778_vm13, %v779_v10, %v777_v20  ;;  %vm888_vm13 = vcmp.eq.f32.partialorder %v3204_v44, inf  ;;  %vm771_vm3 = vcmp.eq.f32.partialorder %v3098_v19, 0.0 }
 0x20a   : > { %v3348_v55 = vpop.eup %2203  ;;  %v3369_v33 = vmul.f32 %v2202_v4, %v3220_v32  ;;  %vm895_vm2 = vcmp.eq.f32.partialorder %v3305_v8, inf  ;;  %v1212_v40 = vunpack.c.l.s4 %v2393_v24  ;;  %v3817_v24 = vand.u32 2147483648, %v3293_v61 }
 0x20b   : > { %v2206_v43 = vpop.eup %2205 }
 0x20c   : > { %v2208_v58 = vpop.eup %2207  ;;  %v943_v63 = vmul.f32 %v2206_v43, %v3245_v15  ;;  %v3390_v43 = vsel %vm930_vm1, %v3222_v0, %v929_v38  ;;  %v3404_v38 = vpack.c.bf16 %v780_v17, %v3278_v59  ;;  %vm939_vm1 = vcmp.eq.f32.partialorder %v3243_v5, 0.0 }
 0x20d   : > { %v2210_v48 = vpop.eup %2209  ;;  %v3393_v7 = vmul.f32 %v2208_v58, %v3236_v12  ;;  %v758_v58 = vand.u32 2147483648, %v3073_v56 }
 0x20e   : > { %v2212_v23 = vpop.eup %2211  ;;  %v936_v51 = vmul.f32 %v2210_v48, %v3243_v5  ;;  %v945_v10 = vsel %vm944_vm4, %v3245_v15, %v943_v63  ;;  %v768_v48 = vmul.f32 %v3215_v18, %v3098_v19  ;;  %v772_v63 = vand.u32 2147483648, %v3098_v19 }
 0x20f   : > { %v2214_v4 = vpop.eup %2213  ;;  %v950_v20 = vmul.f32 %v2212_v23, %v3260_v14  ;;  %v759_v35 = vsel %vm757_vm8, %v758_v58, %v756_v53  ;;  %vm925_vm4 = vcmp.eq.f32.partialorder %v3236_v12, 0.0  ;;  %vm904_vm8 = vcmp.eq.f32.partialorder %v3210_v9, 0.0  ;;  %v3434_v58 = vld.sshfl [vmem:[#allocation6] sm:$0x11 pattern:$0x75316420] }
 0x210   : > { %v3397_v28 = vpop.eup %2215  ;;  %v957_v57 = vmul.f32 %v2214_v4, %v3275_v16 }
 0x211   : > { %v2218_v13 = vpop.eup %2217 }
 0x212   : > { %v2220_v59 = vpop.eup %2219  ;;  %v964_v17 = vmul.f32 %v2218_v13, %v3293_v61  ;;  %v959_v56 = vsel %vm958_vm5, %v3275_v16, %v957_v57  ;;  %v770_v13 = vsel %vm769_vm15, %v3098_v19, %v768_v48  ;;  %v952_v19 = vsel %vm951_vm6, %v3260_v14, %v950_v20 }
 0x213   : > { %v2222_v23 = vpop.eup %2221  ;;  %v773_v57 = vsel %vm771_vm3, %v772_v63, %v770_v13  ;;  %v938_v48 = vsel %vm937_vm10, %v3243_v5, %v936_v51  ;;  %vm911_vm5 = vcmp.eq.f32.partialorder %v3213_v42, 0.0  ;;  %v3818_v13 = vand.u32 2147483648, %v3245_v15 }
 0x214   : > { %v2224_v18 = vpop.eup %2223  ;;  %v971_v53 = vmul.f32 %v2222_v23, %v3314_v45  ;;  %v966_v4 = vsel %vm965_vm7, %v3293_v61, %v964_v17  ;;  %vm874_vm7 = vcmp.eq.f32.partialorder %v3267_v41, inf  ;;  %v3444_v17 = vpack.c.bf16 %v773_v57, %v759_v35 }
 0x215   : > { %v1214_v23 = vlaneseq  ;;  %v969_v20 = vsel %vm967_vm14, %v3817_v24, %v966_v4  ;;  %v948_v51 = vsel %vm946_vm11, %v3818_v13, %v945_v10  ;;  %vm890_vm6 = vcmp.eq.f32.partialorder %v3204_v44, 0.0 }
 0x216   : > { %v973_v63 = vsel %vm972_vm9, %v3314_v45, %v971_v53  ;;  %vm881_vm10 = vcmp.eq.f32.partialorder %v3283_v34, inf  ;;  %v1213_v35 = vunpack.c.0.s8 %v1212_v40  ;;  %v3819_v57 = vand.u32 2147483648, %v3275_v16 }
 0x217   : > { %v976_v30 = vsel %vm974_vm0, %v975_v37, %v973_v63  ;;  %vm860_vm9 = vcmp.eq.f32.partialorder %v3200_v39, inf  ;;  %v1210_v61 = vcombine.high %v3434_v58, %v3434_v58  ;;  %v1215_v15 = vshrl.u32 %v1214_v23, 7 }
 0x218   : > { %v962_v53 = vsel %vm960_vm12, %v3819_v57, %v959_v56  ;;  %v3820_v4 = vand.u32 2147483648, %v3260_v14  ;;  %vm3821_vm14 = vcmp.eq.f32.partialorder %v3260_v14, 0.0  ;;  %vm3822_vm11 = vcmp.eq.f32.partialorder %v3220_v32, inf }
 0x219   : > { %v3468_v10 = vpack.c.bf16 %v976_v30, %v962_v53  ;;  %v917_v16 = vsel %vm3822_vm11, %v3220_v32, %v3369_v33  ;;  %v894_v45 = vmul.f32 %v2224_v18, %v3305_v8  ;;  %vm876_vm12 = vcmp.eq.f32.partialorder %v3267_v41, 0.0 }
 0x21a   : > { %v955_v40 = vsel %vm3821_vm14, %v3820_v4, %v952_v19  ;;  %vm867_vm0 = vcmp.eq.f32.partialorder %v3226_v60, inf  ;;  %v3823_v30 = vand.u32 2147483648, %v3222_v0  ;;  %vm3824_vm3 = vcmp.eq.f32.partialorder %v3222_v0, 0.0 }
 0x21b   : > { %v3481_v37 = vpack.c.bf16 %v969_v20, %v955_v40  ;;  %vm3825_vm15 = vcmp.eq.f32.partialorder %v3236_v12, inf  ;;  %v3494_v33 = vsub.s32 %v1213_v35, %v1215_v15  ;;  %1243 = vmatprep.subr.bf16.mxu1 %v3468_v10  ;;  %v3826_v19 = vand.u32 2147483648, %v3243_v5 }
 0x21c   : > { %v934_v14 = vsel %vm3824_vm3, %v3823_v30, %v3390_v43  ;;  %v924_v56 = vsel %vm3825_vm15, %v3236_v12, %v3393_v7  ;;  %vm3827_vm3 = vcmp.eq.f32.partialorder %v3210_v9, inf  ;;  %v873_v7 = vmul.f32 %v3397_v28, %v3267_v41 }
 0x21d   : > { %v3497_v18 = vpack.c.bf16 %v948_v51, %v934_v14  ;;  %v941_v0 = vsel %vm939_vm1, %v3826_v19, %v938_v48  ;;  %v903_v43 = vsel %vm3827_vm3, %v3210_v9, %v3354_v36  ;;  %vm862_vm15 = vcmp.eq.f32.partialorder %v3200_v39, 0.0  ;;  %1244 = vmatpush2.bf16.msra.mxu1 %v3481_v37 }
 0x21e   : > { %vm853_vm11 = vcmp.eq.f32.partialorder %v3196_v46, inf  ;;  %v3828_v23 = vand.u32 2147483648, %v3220_v32  ;;  %vm3829_vm14 = vcmp.eq.f32.partialorder %v3220_v32, 0.0  ;;  %vm3830_vm1 = vcmp.eq.f32.partialorder %v3213_v42, inf }
 0x21f   : > { %v910_v48 = vsel %vm3830_vm1, %v3213_v42, %v3358_v52  ;;  %v880_v36 = vmul.f32 %v2220_v59, %v3283_v34  ;;  %vm832_vm3 = vcmp.eq.f32.partialorder %v3182_v11, inf  ;;  %v1224_v28 = vrot.slane %v1210_v61, %v3494_v33  ;;  %1245 = vmatprep.subr.bf16.mxu1 %v3497_v18 }
 0x220   : > { %v920_v5 = vsel %vm3829_vm14, %v3828_v23, %v917_v16  ;;  %v3831_v63 = vand.u32 2147483648, %v3236_v12  ;;  %v912_v32 = vand.u32 2147483648, %v3213_v42  ;;  %v889_v52 = vsel %vm888_vm13, %v3204_v44, %v3346_v31 }
 0x221   : > { %vm848_vm14 = vcmp.eq.f32.partialorder %v3192_v3, 0.0  ;;  %v859_v59 = vmul.f32 %v3311_v6, %v3200_v39  ;;  %vm839_vm1 = vcmp.eq.f32.partialorder %v3187_v22, inf  ;;  %v3832_v13 = vand.u32 2147483648, %v3210_v9  ;;  %1259 = vmatprep.mubr.bf16.mxu1 %v1224_v28 }
 0x222   : > { %v927_v24 = vsel %vm925_vm4, %v3831_v63, %v924_v56  ;;  %v896_v51 = vsel %vm895_vm2, %v3305_v8, %v894_v45  ;;  %v866_v31 = vmul.f32 %v3348_v55, %v3226_v60  ;;  %vm818_vm13 = vcmp.eq.f32.partialorder %v3170_v29, inf }
 0x223   : > { %v3537_v20 = vpack.c.bf16 %v941_v0, %v927_v24  ;;  %v906_v12 = vsel %vm904_vm8, %v3832_v13, %v903_v43  ;;  %v913_v35 = vsel %vm911_vm5, %v912_v32, %v910_v48  ;;  %v875_v9 = vsel %vm874_vm7, %v3267_v41, %v873_v7 }
 0x224   : > { %v3549_v6 = vpack.c.bf16 %v920_v5, %v906_v12  ;;  %v845_v57 = vmul.f32 %v3290_v2, %v3192_v3  ;;  %vm834_vm2 = vcmp.eq.f32.partialorder %v3182_v11, 0.0  ;;  %vm825_vm4 = vcmp.eq.f32.partialorder %v3178_v25, inf }
 0x225   : > { %1246 = vmatpush2.bf16.msra.mxu1 %v3537_v20  ;;  %vm897_vm8 = vcmp.eq.f32.partialorder %v3305_v8, 0.0  ;;  %v3833_v55 = vand.u32 2147483648, %v3204_v44  ;;  %v882_v53 = vsel %vm881_vm10, %v3283_v34, %v880_v36  ;;  %v852_v2 = vmul.f32 %v3301_v21, %v3196_v46 }
 0x226   : > { %1247 = vmatprep.subr.bf16.mxu1 %v3549_v6  ;;  %v3834_v61 = vand.u32 2147483648, %v3305_v8  ;;  %v884_v4 = vand.u32 2147483648, %v3283_v34  ;;  %v861_v40 = vsel %vm860_vm9, %v3200_v39, %v859_v59  ;;  %v831_v44 = vmul.f32 %v3272_v26, %v3182_v11 }
 0x227   : > { %v892_v42 = vsel %vm890_vm6, %v3833_v55, %v889_v52  ;;  %v3835_v45 = vand.u32 2147483648, %v3267_v41  ;;  %v868_v8 = vsel %vm867_vm0, %v3226_v60, %v866_v31  ;;  %v838_v30 = vmul.f32 %v3280_v54, %v3187_v22  ;;  %v3845_v55 = vld [vmem:[#allocation21_spill] sm:$0xff] }
 0x228   : > { %v899_v15 = vsel %vm897_vm8, %v3834_v61, %v896_v51  ;;  %vm3836_vm5 = vcmp.eq.f32.partialorder %v3283_v34, 0.0  ;;  %vm3837_vm7 = vcmp.eq.f32.partialorder %v3192_v3, inf  ;;  %v817_v41 = vmul.f32 %v3257_v1, %v3170_v29  ;;  %v3849_v61 = vld [vmem:[#allocation25_spill] sm:$0xff] }
 0x229   : > { %v3580_v16 = vpack.c.bf16 %v913_v35, %v899_v15  ;;  %v878_v21 = vsel %vm876_vm12, %v3835_v45, %v875_v9  ;;  %v885_v56 = vsel %vm3836_vm5, %v884_v4, %v882_v53  ;;  %v847_v26 = vsel %vm3837_vm7, %v3192_v3, %v845_v57  ;;  %v3842_v9 = vld [vmem:[#allocation18_spill] sm:$0xff]  ;;  %v3843_v57 = vld [vmem:[#allocation19_spill] sm:$0xff]  ;;  %v3852_v15 = vld [vmem:[#allocation28_spill] sm:$0xff] }
 0x22a   : > { %v3591_v14 = vpack.c.bf16 %v892_v42, %v878_v21  ;;  %vm869_vm6 = vcmp.eq.f32.partialorder %v3226_v60, 0.0  ;;  %v3838_v19 = vand.u32 2147483648, %v3200_v39  ;;  %v854_v34 = vsel %vm853_vm11, %v3196_v46, %v852_v2  ;;  %v3846_v42 = vld [vmem:[#allocation22_spill] sm:$0xff]  ;;  %v3847_v53 = vld [vmem:[#allocation23_spill] sm:$0xff]  ;;  %v3848_v2 = vld [vmem:[#allocation24_spill] sm:$0xff] }
 0x22b   : > { %1248 = vmatpush2.bf16.msra.mxu1 %v3580_v16  ;;  %v824_v0 = vmul.f32 %v3264_v62, %v3178_v25  ;;  %v3839_v1 = vand.u32 2147483648, %v3226_v60  ;;  %vm855_vm10 = vcmp.eq.f32.partialorder %v3196_v46, 0.0  ;;  %v856_v7 = vand.u32 2147483648, %v3196_v46  ;;  %v3853_v4 = vld [vmem:[#allocation17_spill] sm:$0xff]  ;;  %v3856_v45 = vld [vmem:[#allocation15_spill] sm:$0xff]  ;;  %v3857_v21 = vld [vmem:[#allocation16_spill] sm:$0xff] }
 0x22c   : > { %v864_v54 = vsel %vm862_vm15, %v3838_v19, %v861_v40  ;;  %1249 = vmatprep.subr.bf16.mxu1 %v3591_v14  ;;  %v833_v39 = vsel %vm832_vm3, %v3182_v11, %v831_v44  ;;  %v3840_v5 = vand.u32 2147483648, %v3192_v3  ;;  %v840_v62 = vsel %vm839_vm1, %v3187_v22, %v838_v30  ;;  %v3854_v40 = vld [vmem:[#allocation13_spill] sm:$0xff]  ;;  %v3855_v44 = vld [vmem:[#allocation14_spill] sm:$0xff] }
 0x22d   : > { %v871_v43 = vsel %vm869_vm6, %v3839_v1, %v868_v8  ;;  %v810_v60 = vmul.f32 %v3250_v49, %v3163_v50  ;;  %v842_v46 = vand.u32 2147483648, %v3187_v22  ;;  %v857_v28 = vsel %vm855_vm10, %v856_v7, %v854_v34  ;;  %v2082_v34 = vld [vmem:[#allocation8 + $0x38] sm:$0xff]   ;;  %v2084_v1 = vld [vmem:[#allocation8 + $0x30] sm:$0xff]   ;;  %v2086_v7 = vld [vmem:[#allocation8 + $0x28] sm:$0xff]  }
 0x22e   : > { %v1001_v23 = vpack.c.bf16 %v885_v56, %v871_v43  ;;  %v850_v48 = vsel %vm848_vm14, %v3840_v5, %v847_v26  ;;  %v819_v63 = vsel %vm818_vm13, %v3170_v29, %v817_v41  ;;  %vm841_vm9 = vcmp.eq.f32.partialorder %v3187_v22, 0.0  ;;  %v2085_v43 = vld [vmem:[#allocation8 + $0x68] sm:$0xff]   ;;  %v2089_v5 = vld [vmem:[#allocation8 + $0x58] sm:$0xff]  }
 0x22f   : > { %v1000_v36 = vpack.c.bf16 %v864_v54, %v850_v48  ;;  %v821_v3 = vand.u32 2147483648, %v3170_v29  ;;  %v3841_v24 = vand.u32 2147483648, %v3182_v11  ;;  %v826_v49 = vsel %vm825_vm4, %v3178_v25, %v824_v0  ;;  %v2081_v54 = vld [vmem:[#allocation8 + $0x78] sm:$0xff]   ;;  %v2083_v0 = vld [vmem:[#allocation8 + $0x70] sm:$0xff]  }
 0x230   : > { %1250 = vmatpush2.bf16.msra.mxu1 %v1001_v23  ;;  %v843_v52 = vsel %vm841_vm9, %v842_v46, %v840_v62  ;;  %vm820_vm12 = vcmp.eq.f32.partialorder %v3170_v29, 0.0  ;;  %vm811_vm0 = vcmp.eq.f32.partialorder %v3163_v50, inf  ;;  %v828_v59 = vand.u32 2147483648, %v3178_v25  ;;  %1983 = vmatprep.subr.bf16.mxu0 %v2081_v54  ;;  %v2090_v48 = vld [vmem:[#allocation8 + $0x18] sm:$0xff]   ;;  %v2091_v62 = vld [vmem:[#allocation8 + $0x50] sm:$0xff]   ;;  %v2094_v46 = vld [vmem:[#allocation8 + $0x8] sm:$0xff]  }
 0x231   : > { %v836_v32 = vsel %vm834_vm2, %v3841_v24, %v833_v39  ;;  %1251 = vmatprep.subr.bf16.mxu1 %v1000_v36  ;;  %v999_v22 = vpack.c.bf16 %v857_v28, %v843_v52  ;;  %v822_v13 = vsel %vm820_vm12, %v821_v3, %v819_v63  ;;  %v812_v12 = vsel %vm811_vm0, %v3163_v50, %v810_v60  ;;  %v2087_v39 = vld [vmem:[#allocation8 + $0x60] sm:$0xff]   ;;  %v2092_v60 = vld [vmem:[#allocation8 + $0x10] sm:$0xff]  }
 0x232   : > { %vm827_vm11 = vcmp.eq.f32.partialorder %v3178_v25, 0.0  ;;  %v998_v11 = vpack.c.bf16 %v836_v32, %v822_v13  ;;  %v814_v51 = vand.u32 2147483648, %v3163_v50  ;;  %vm813_vm15 = vcmp.eq.f32.partialorder %v3163_v50, 0.0  ;;  %v3844_v50 = vld [vmem:[#allocation20_spill] sm:$0xff]  ;;  %1984 = vmatpush3.bf16.msra.mxu0 %v2082_v34 }
 0x233   : > { %v829_v31 = vsel %vm827_vm11, %v828_v59, %v826_v49  ;;  %v1217_v25 = vrot.slane %v3434_v58, %v3494_v33  ;;  %v3850_v58 = vld [vmem:[#allocation26_spill] sm:$0xff]  ;;  %v3851_v33 = vld [vmem:[#allocation27_spill] sm:$0xff]  ;;  %vm1268_vm3 = vcmask 1040384   ;;  %1985 = vmatprep.subr.bf16.mxu0 %v2083_v0  ;;  %v2095_v28 = vld [vmem:[#allocation8 + $0x40] sm:$0xff]  }
 0x234   : > { %1252 = vmatpush2.bf16.msra.mxu1 %v999_v22  ;;  %v815_v35 = vsel %vm813_vm15, %v814_v51, %v812_v12  ;;  %v2096_v63 = vld [vmem:[#allocation8] sm:$0xff]  }
 0x235   : > { %1253 = vmatprep.subr.bf16.mxu1 %v998_v11  ;;  %v997_v29 = vpack.c.bf16 %v829_v31, %v815_v35 }
 0x236   : > { %1986 = vmatpush3.bf16.msra.mxu0 %v2084_v1 }
 0x237   : > { %1987 = vmatprep.subr.bf16.mxu0 %v2085_v43 }
 0x238   : > { %1254 = vmatpush2.bf16.msra.mxu1 %v997_v29 }
 0x239   : > { %1255 = vmatprep.subr.bf16.mxu1 %v3360_v47 }
 0x23a   : > { %1988 = vmatpush3.bf16.msra.mxu0 %v2086_v7 }
 0x23b   : > { %1989 = vmatprep.subr.bf16.mxu0 %v2087_v39 }
 0x23c   : > { %1256 = vmatpush2.bf16.msra.mxu1 %v3362_v27 }
 0x23d   : > { %1257 = vmatprep.subr.bf16.mxu1 %v3404_v38 }
 0x240   : > { %1258 = vmatpush2.bf16.msra.mxu1 %v3444_v17 }
 0x241   : > { %1482 = vmatprep.subr.bf16.mxu1 %v3842_v9 }
 0x243   : > { %1260 = vmatmul.mubr.bf16.vlgmr.msra.gmra.mxu1 %v1217_v25  ;;  %v1557_v25 = vld [vmem:[%s3729_s3] sm:$0x1] }
 0x244   : > { %1483 = vmatpush1.bf16.msra.mxu1 %v3843_v57 }
 0x245   : > { %1484 = vmatprep.subr.bf16.mxu1 %v3844_v50 }
 0x248   : > { %1485 = vmatpush1.bf16.msra.mxu1 %v3845_v55 }
 0x249   : > { %1486 = vmatprep.subr.bf16.mxu1 %v3846_v42 }
 0x24c   : > { %1487 = vmatpush1.bf16.msra.mxu1 %v3847_v53 }
 0x24d   : > { %1488 = vmatprep.subr.bf16.mxu1 %v3848_v2 }
 0x250   : > { %1489 = vmatpush1.bf16.msra.mxu1 %v3849_v61 }
 0x251   : > { %1490 = vmatprep.subr.bf16.mxu1 %v3850_v58 }
 0x254   : > { %1491 = vmatpush1.bf16.msra.mxu1 %v3851_v33 }
 0x255   : > { %1492 = vmatprep.subr.bf16.mxu1 %v3852_v15 }
 0x258   : > { %1493 = vmatpush1.bf16.msra.mxu1 %v3853_v4 }
 0x259   : > { %1494 = vmatprep.subr.bf16.mxu1 %v3854_v40 }
 0x25c   : > { %1495 = vmatpush1.bf16.msra.mxu1 %v3855_v44 }
 0x25d   : > { %1496 = vmatprep.subr.bf16.mxu1 %v3856_v45 }
 0x260   : > { %1497 = vmatpush1.bf16.msra.mxu1 %v3857_v21 }
 0x261   : > { %1498 = vmatprep.subr.bf16.mxu1 %v3468_v10 }
 0x264   : > { %1499 = vmatpush2.bf16.msra.mxu1 %v3481_v37 }
 0x265   : > { %1500 = vmatprep.subr.bf16.mxu1 %v3497_v18 }
 0x268   : > { %1501 = vmatpush2.bf16.msra.mxu1 %v3537_v20 }
 0x269   : > { %1502 = vmatprep.subr.bf16.mxu1 %v3549_v6 }
 0x26c   : > { %1503 = vmatpush2.bf16.msra.mxu1 %v3580_v16 }
 0x26d   : > { %1504 = vmatprep.subr.bf16.mxu1 %v3591_v14 }
 0x270   : > { %1505 = vmatpush2.bf16.msra.mxu1 %v1001_v23  ;;  %v2088_v23 = vld [vmem:[#allocation8 + $0x20] sm:$0xff]  }
 0x271   : > { %1506 = vmatprep.subr.bf16.mxu1 %v1000_v36  ;;  %1990 = vmatpush3.bf16.msra.mxu0 %v2088_v23  ;;  %v2093_v36 = vld [vmem:[#allocation8 + $0x48] sm:$0xff]  }
 0x272   : > { %1991 = vmatprep.subr.bf16.mxu0 %v2089_v5 }
 0x274   : > { %1507 = vmatpush2.bf16.msra.mxu1 %v999_v22 }
 0x275   : > { %1508 = vmatprep.subr.bf16.mxu1 %v998_v11  ;;  %1992 = vmatpush3.bf16.msra.mxu0 %v2090_v48 }
 0x276   : > { %1993 = vmatprep.subr.bf16.mxu0 %v2091_v62 }
 0x278   : > { %1509 = vmatpush2.bf16.msra.mxu1 %v997_v29 }
 0x279   : > { %1510 = vmatprep.subr.bf16.mxu1 %v3360_v47  ;;  %1994 = vmatpush3.bf16.msra.mxu0 %v2092_v60 }
 0x27a   : > { %1995 = vmatprep.subr.bf16.mxu0 %v2093_v36 }
 0x27c   : > { %1511 = vmatpush2.bf16.msra.mxu1 %v3362_v27 }
 0x27d   : > { %1512 = vmatprep.subr.bf16.mxu1 %v3404_v38  ;;  %1996 = vmatpush3.bf16.msra.mxu0 %v2094_v46 }
 0x27e   : > { %1997 = vmatprep.subr.bf16.mxu0 %v2095_v28 }
 0x280   : > { %1513 = vmatpush2.bf16.msra.mxu1 %v3444_v17 }
 0x281   : > { %1998 = vmatpush3.bf16.msra.mxu0 %v2096_v63 }
 0x303   : > { %v1261_v10 = vpop.f32.mrf.mxu1 }
 0x304   : > { %v1269_v18 = vsel %vm1268_vm3, %v1261_v10, -inf }
 0x305   : > { %v1263_v37 = vpop.f32.mrf.mxu1 }
 0x306   : > { %v1270_v20 = vsel %vm1268_vm3, %v1263_v37, -inf }
 0x307   : > { %v1265_v6 = vpop.f32.mrf.mxu1  ;;  %v1271_v16 = vmax.f32 %v1269_v18, %v1270_v20 }
 0x309   : > { %1272 = vmax.xlane.f32.xlu1 %v1271_v16  ;;  %v1266_v8 = vpop.f32.mrf.mxu1 }
 0x392   : > { %v1273_v30 = vpop.xlane.xlu1 %1272 }
 0x393   : > { %v1274_v14 = vsub.f32 %v1261_v10, %v1273_v30  ;;  %v1275_v47 = vsub.f32 %v1263_v37, %v1273_v30 }
 0x395   : > { %v1276_v56 = vmul.f32 1.442695, %v1274_v14  ;;  %v1278_v27 = vmul.f32 1.442695, %v1275_v47 }
 0x397   : > { %2225 = vpow2.f32 %v1276_v56 }
 0x398   : > { %2227 = vpow2.f32 %v1278_v27 }
 0x3a4   : > { %v2226_v38 = vpop.eup %2225 }
 0x3a5   : > { %v2228_v17 = vpop.eup %2227  ;;  %v1280_v26 = vsel %vm1268_vm3, %v2226_v38, 0.0 }
 0x3a6   : > { %v1281_v41 = vsel %vm1268_vm3, %v2228_v17, 0.0 }
 0x3a7   : > { %v1282_v19 = vadd.f32 %v1281_v41, %v1280_v26 }
 0x3a9   : > { %1283 = vadd.xlane.f32.xlu1 %v1282_v19 }
 0x432   : > { %v1284_v3 = vpop.xlane.xlu1 %1283 }
 0x433   : > { %2229 = vrcp.f32 %v1284_v3 }
 0x440   : > { %v2230_v24 = vpop.eup %2229 }
 0x441   : > { %v1287_v32 = vmul.f32 %v2230_v24, %v2228_v17  ;;  %v1286_v49 = vmul.f32 %v2230_v24, %v2226_v38 }
 0x443   : > { %v1289_v52 = vpack.c.bf16 %v1287_v32, %v1287_v32  ;;  %v1288_v59 = vpack.c.bf16 %v1286_v49, %v1286_v49 }
 0x445   : > { %1514 = vmatprep.mubr.bf16.mxu1 %v1289_v52 }
 0x446   : > { %1515 = vmatmul.mubr.bf16.vlgmr.msra.gmra.mxu1 %v1288_v59 }
 0x506   : > { %v1516_v22 = vpop.f32.mrf.mxu1 }
 0x507   : > { %v1523_v11 = vpack.c.bf16 %v1516_v22, %v1516_v22 }
 0x508   : > { %v1518_v13 = vpop.f32.mrf.mxu1 }
 0x509   : > { %v1524_v12 = vpack.c.bf16 %v1518_v13, %v1518_v13 }
 0x50a   : > { %v1520_v51 = vpop.f32.mrf.mxu1 }
 0x50b   : > { %1686 = vmatprep.mubr.bf16.mxu0 %v1524_v12 }
 0x50c   : > { %v1521_v31 = vpop.f32.mrf.mxu1  ;;  %1687 = vmatmul.mubr.bf16.vlgmr.msra.gmra.mxu0 %v1523_v11 }
 0x5cc   : > { %v1999_v35 = vpop.f32.mrf.mxu0 }
 0x5ce   : > { %v2000_v29 = vpop.f32.mrf.mxu0 }
 0x5cf   : > { %v2001_v9 = vadd.f32 %v2000_v29, %v1999_v35 }
 0x5d0   : > { %v2002_v57 = vpop.f32.mrf.mxu0 }
 0x5d1   : > { %v1689_v50 = vadd.f32 %v2001_v9, %v1557_v25 }
 0x5d2   : > { %v2003_v55 = vpop.f32.mrf.mxu0 }
 0x5d3   : > { %v1694_v42 = vsel %vm1268_vm3, %v1689_v50, -inf }
 0x5d4   : > { %1695 = vmax.xlane.f32.xlu1 %v1694_v42 }
 0x65d   : > { %v1696_v53 = vpop.xlane.xlu1 %1695 }
 0x65e   : > { %v1697_v2 = vsub.f32 %v1689_v50, %v1696_v53 }
 0x660   : > { %v1698_v61 = vmul.f32 1.442695, %v1697_v2 }
 0x662   : > { %2231 = vpow2.f32 %v1698_v61 }
 0x66f   : > { %v2232_v58 = vpop.eup %2231 }
 0x670   : > { %v1700_v33 = vsel %vm1268_vm3, %v2232_v58, 0.0 }
 0x671   : > { %1701 = vadd.xlane.f32.xlu1 %v1700_v33 }
 0x6fa   : > { %v1702_v15 = vpop.xlane.xlu1 %1701 }
 0x6fb   : > { %2233 = vrcp.f32 %v1702_v15 }
 0x708   : > { %v2234_v4 = vpop.eup %2233 }
 0x709   : > { %v1704_v40 = vmul.f32 %v2234_v4, %v2232_v58 }
 0x70b   : > { %1705 = vst [vmem:[%s241_s7] sm:$0x1] %v1704_v40 }
 0x70c   : > { %2328 = shalt.err (!%p2325_p12)
}
 0x70d   : > { %s2329_s10 = scalar_lea.hbm %s1717_s25, 16  ;;  %s2333_s9 = scalar_lea.hbm %s3730_s4, 32 }
 0x70e   : > { %p2330_p6 = scmp.ne.s32.totalorder %s1717_s25, %s2329_s10  ;;  %p2334_p13 = scmp.lt.s32.totalorder %s1717_s25, %s3730_s4 }
 0x70f   : > { %p2335_p8 = scmp.lt.s32.totalorder %s2333_s9, %s2329_s10 }
 0x710   : > { %p2331_p7 = pnand %p2330_p6, %p3858_p0 }
 0x711   : > { %p2336_p3 = por %p2335_p8, %p2334_p13 }
 0x712   : > { %p2332_p11 = pneg %p2331_p7 }
 0x714   : > { %p2337_p2 = pnand %p2336_p3, %p2332_p11 }
 0x716   : > { %2340 = shalt.err (!%p2337_p2)
}
 0x717   : > { %2015 = dma.vmem_to_hbm [thread:$0]  (%p3858_p0), %s1720_s11, 16, %s1717_s25, %s1707_s13  }
 0x718 PF: > { %s1731_s1 = sand.u32 1, %s2371_s15   ;;  %p3859_p4 = scmp.ne.s32.totalorder %s3755_s28, 0 }
 0x719   : > { %p3860_p5 = scmp.ge.s32.totalorder %s2383_s18, 2  ;;  %s1732_s26 = scalar_lea.sflag [#allocation5], %s1731_s1 }
 0x71b   : > { %p2029_p9 = pnand %p3860_p5, %p3859_p4 }
 0x71d   : > { %p2030_p10 = pneg %p2029_p9 }
 0x71f   : > { %2366 = dma.done.wait (%p2030_p10), %s1732_s26, 16  }
 0x720   : > { %2368 = vsyncadd (%p2030_p10), %s1732_s26, 4294967280  ;;  %p18_p1 = scmp.ge.s32.totalorder %s2445_s21, 4   ;;  %s3861_s15 = smov %s2375_s16 }
 0x721   : > { %s3862_s16 = smov %s2379_s17  ;;  %s3863_s17 = smov %s2457_s24 }
 0x722   : > { %s3864_s18 = smov %s2445_s21  ;;  %20 = sbr.rel (!%p18_p1) target bundleno = 8 (0x8), region = 89 }
 0x727   :  { %1736 = vsyncpa [#allocation4], 1 }
 0x728   :  { %1738 = vsyncpa [#allocation4 + $0x1], 1 }
 0x729   :  { %1739 = vsyncpa [#allocation7], 1 }
 0x72a   :  { %1740 = vsyncpa [#allocation5], 1 }
 0x72b   :  { %1742 = vsyncpa [#allocation5 + $0x1], 1 }

</bundles_post_ra>
